<compile_context>
chip_gen: v5e
topology: v5e:2x2
jax: 0.10.0
libtpu: 0.0.40
codegen_flags: <defaults>
</compile_context>

<pallas_src>
import functools

import jax
import jax.numpy as jnp
import numpy as np
from jax import lax
from jax.experimental import pallas as pl
from jax.experimental.pallas import tpu as pltpu

CIN_PAD = 8  # all conv channel axes padded to one full sublane group (f32)


# -----------------------------------------------------------------------------
# Fused Pallas kernel: relayout -> 4x (conv3x3 [+BN] + act) -> flatten -> MLP
# -----------------------------------------------------------------------------
def _cswm_fused_kernel(obs_ref, mask_ref, wfs_ref, cvec_ref,
                       w1_ref, w2_ref, w3_ref, rvec_ref,
                       o_ref, *, B, C, K, H, W, E, CP):
  """All activations stay in VMEM; layout is (channels_pad=8, B*H*W) f32."""
  L = B * H * W
  HW = H * W
  eps = jnp.float32(1e-5)
  inv_l = jnp.float32(1.0 / L)

  mask = mask_ref[...]                       # (9*CP, L) 0/1, precomputed on host
  wfs = wfs_ref[...]                         # (4*CP, 9*CP) padded conv weights
  cv = cvec_ref[...]                         # (CP, 8) per-channel vectors
  rv = rvec_ref[...]                         # (5, hidden) MLP vectors

  # ---- lane-dense relayout: obs (B*C, HW) -> x (CP, B*HW), padded chans = 0
  obs_v = obs_ref[...]
  zpad = jnp.zeros((CP - C, HW), jnp.float32)
  x = jnp.concatenate(
      [jnp.concatenate([obs_v[b * C:(b + 1) * C, :], zpad], axis=0)
       for b in range(B)], axis=1)           # (CP, L)

  def conv3x3(x, wflat):
    """x: (CP, L) -> (Cout, L). 'same' conv = 9 lane rolls + 1 mask mul + 1 MXU."""
    taps = []
    for dy in range(3):
      for dx in range(3):
        s = (dy - 1) * W + (dx - 1)          # source offset in flat layout
        taps.append(x if s == 0 else pltpu.roll(x, (-s) % L, axis=1))
    patches = jnp.concatenate(taps, axis=0) * mask      # (9*CP, L)
    return jnp.dot(wflat, patches, preferred_element_type=jnp.float32)

  def bn_relu(z, g, be):
    """Training-mode BatchNorm2d (batch stats, biased var) + ReLU.

    One fused cross-lane reduction: stack [z; z*z] along sublanes, mean once.
    """
    st = jnp.concatenate([z, z * z], axis=0)            # (2*CP, L)
    s = jnp.sum(st, axis=1, keepdims=True) * inv_l      # (2*CP, 1)
    m, m2 = s[:CP], s[CP:]
    v = jnp.maximum(m2 - m * m, 0.0)
    scale = g * lax.rsqrt(v + eps)                      # padded g==0 -> row stays 0
    shift = be - m * scale
    return jnp.maximum(z * scale + shift, 0.0)

  # ---------------- EncoderCNNLarge ----------------
  h = bn_relu(conv3x3(x, wfs[0 * CP:1 * CP]), cv[:, 0:1], cv[:, 1:2])
  h = bn_relu(conv3x3(h, wfs[1 * CP:2 * CP]), cv[:, 2:3], cv[:, 3:4])
  h = bn_relu(conv3x3(h, wfs[2 * CP:3 * CP]), cv[:, 4:5], cv[:, 5:6])
  h = jax.nn.sigmoid(conv3x3(h, wfs[3 * CP:3 * CP + K]) + cv[:K, 6:7])  # (K, L)

  # ---------------- flatten to (B*K, H*W): 128-aligned lane slices ----------
  mlp_in = jnp.concatenate([h[:, b * HW:(b + 1) * HW] for b in range(B)],
                           axis=0)                      # (B*K, HW)

  # ---------------- EncoderMLP ----------------
  z = jnp.dot(mlp_in, w1_ref[...], preferred_element_type=jnp.float32)
  z = jnp.maximum(z + rv[0:1, :], 0.0)
  z = jnp.dot(z, w2_ref[...], preferred_element_type=jnp.float32) + rv[1:2, :]
  mu = jnp.mean(z, axis=-1, keepdims=True)
  var = jnp.mean((z - mu) ** 2, axis=-1, keepdims=True)
  z = (z - mu) * lax.rsqrt(var + eps) * rv[2:3, :] + rv[3:4, :]
  z = jnp.maximum(z, 0.0)
  o_ref[...] = (jnp.dot(z, w3_ref[...], preferred_element_type=jnp.float32)
                + rv[4:5, :E])


# -----------------------------------------------------------------------------
# Host-side packing (done ONCE, outside the per-call path)
# -----------------------------------------------------------------------------
@functools.lru_cache(maxsize=None)
def _tap_masks(B, H, W, cp):
  """Pre-expanded (9*cp, B*H*W) 0/1 boundary masks for the 3x3 'same' conv."""
  L = B * H * W
  pix = np.arange(L) % (H * W)
  ii = pix // W
  jj = pix % W
  m = np.zeros((9 * cp, L), np.float32)
  for dy in range(3):
    for dx in range(3):
      t = dy * 3 + dx
      valid = ((ii + dy >= 1) & (ii + dy <= H) &
               (jj + dx >= 1) & (jj + dx <= W))
      m[t * cp:(t + 1) * cp, :] = valid.astype(np.float32)[None, :]
  return jnp.asarray(m)


def pack_params(p, *, cp=CIN_PAD):
  """Pre-pack PyTorch-layout params into kernel layout (8 DMAs total)."""
  hid = p["c1_w"].shape[0]          # CNN hidden channels (hidden_dim // 16)
  K = p["c4_w"].shape[0]            # num_objects
  E = p["w3"].shape[1]              # embedding_dim
  Hd = p["w1"].shape[1]             # MLP hidden

  def wflat(w):                     # OIHW -> (cp, (dy*3+dx)*cp + ci), zero-padded
    co, ci = int(w.shape[0]), int(w.shape[1])
    out = np.zeros((cp, 3, 3, cp), np.float32)
    out[:co, :, :, :ci] = np.asarray(w).transpose(0, 2, 3, 1)
    return out.reshape(cp, 9 * cp)

  # Conv bias on BN layers is exactly cancelled by the mean subtraction -> dropped.
  wfs = np.concatenate([wflat(p["c1_w"]), wflat(p["c2_w"]),
                        wflat(p["c3_w"]), wflat(p["c4_w"])], axis=0)  # (4*cp, 9*cp)

  cvecs = np.zeros((cp, 8), np.float32)     # columns: g1 b1 g2 b2 g3 b3 c4b -
  for j, name in enumerate(("bn1_g", "bn1_b", "bn2_g", "bn2_b", "bn3_g", "bn3_b")):
    cvecs[:hid, j] = np.asarray(p[name])
  cvecs[:K, 6] = np.asarray(p["c4_b"])

  rvecs = np.zeros((5, Hd), np.float32)     # rows: b1 b2 ln_g ln_b b3(pad)
  rvecs[0] = np.asarray(p["b1"])
  rvecs[1] = np.asarray(p["b2"])
  rvecs[2] = np.asarray(p["ln_g"])
  rvecs[3] = np.asarray(p["ln_b"])
  rvecs[4, :E] = np.asarray(p["b3"])

  return {"wfs": jnp.asarray(wfs), "cvecs": jnp.asarray(cvecs),
          "rvecs": jnp.asarray(rvecs),
          "w1": jnp.asarray(p["w1"]), "w2": jnp.asarray(p["w2"]),
          "w3": jnp.asarray(p["w3"])}


# -----------------------------------------------------------------------------
# Wrapper: zero-cost reshape only, single pallas_call
# -----------------------------------------------------------------------------
def _vmem_full(shape):
  n = len(shape)
  return pl.BlockSpec(shape, lambda i, n=n: (0,) * n)


def cswm_forward(obs, packed, *, K, E, CP=CIN_PAD):
  """ContrastiveSWM.forward: obs (B, C, H, W) -> state (B, num_objects, emb)."""
  B, C, H, W = obs.shape
  obs_flat = obs.reshape(B * C, H * W)          # contiguity-preserving reshape
  mask = _tap_masks(B, H, W, CP)                # cached host constant

  args = (obs_flat, mask, packed["wfs"], packed["cvecs"],
          packed["w1"], packed["w2"], packed["w3"], packed["rvecs"])

  kern = functools.partial(_cswm_fused_kernel,
                           B=B, C=C, K=K, H=H, W=W, E=E, CP=CP)
  out = pl.pallas_call(
      kern,
      out_shape=jax.ShapeDtypeStruct((B * K, E), jnp.float32),
      grid=(1,),
      in_specs=[_vmem_full(a.shape) for a in args],
      out_specs=_vmem_full((B * K, E)),
  )(*args)
  return out.reshape(B, K, E)


# -----------------------------------------------------------------------------
# Deterministic parameter construction + pure-JAX reference
# -----------------------------------------------------------------------------
def init_params(key, num_channels, hidden_dim, num_objects, embedding_dim, hw):
  cnn_hid = hidden_dim // 16
  D = hw * hw
  ks = jax.random.split(key, 16)
  n = lambda k, s, sc=0.1: (sc * jax.random.normal(k, s)).astype(jnp.float32)
  p = {
      # EncoderCNNLarge (PyTorch OIHW conv weights)
      "c1_w": n(ks[0], (cnn_hid, num_channels, 3, 3)),
      "c1_b": n(ks[1], (cnn_hid,)),
      "bn1_g": 1.0 + n(ks[2], (cnn_hid,)), "bn1_b": n(ks[3], (cnn_hid,)),
      "c2_w": n(ks[4], (cnn_hid, cnn_hid, 3, 3)), "c2_b": n(ks[5], (cnn_hid,)),
      "bn2_g": 1.0 + n(ks[6], (cnn_hid,)), "bn2_b": n(ks[7], (cnn_hid,)),
      "c3_w": n(ks[8], (cnn_hid, cnn_hid, 3, 3)), "c3_b": n(ks[9], (cnn_hid,)),
      "bn3_g": 1.0 + n(ks[10], (cnn_hid,)), "bn3_b": n(ks[11], (cnn_hid,)),
      "c4_w": n(ks[12], (num_objects, cnn_hid, 3, 3)),
      "c4_b": n(ks[13], (num_objects,)),
  }
  km = jax.random.split(ks[14], 8)
  # EncoderMLP (PyTorch Linear weights are (out, in); stored transposed for x@W)
  p.update({
      "w1": n(km[0], (hidden_dim, D)).T, "b1": n(km[1], (hidden_dim,)),
      "w2": n(km[2], (hidden_dim, hidden_dim)).T, "b2": n(km[3], (hidden_dim,)),
      "ln_g": 1.0 + n(km[4], (hidden_dim,)), "ln_b": n(km[5], (hidden_dim,)),
      "w3": n(km[6], (embedding_dim, hidden_dim)).T,
      "b3": n(km[7], (embedding_dim,)),
  })
  return p


def reference_forward(obs, p):
  def conv(x, w, b):
    y = lax.conv_general_dilated(x, w, (1, 1), ((1, 1), (1, 1)),
                                 dimension_numbers=("NCHW", "OIHW", "NCHW"))
    return y + b[None, :, None, None]

  def bn(x, g, be):
    mu = jnp.mean(x, axis=(0, 2, 3), keepdims=True)
    var = jnp.mean((x - mu) ** 2, axis=(0, 2, 3), keepdims=True)
    return ((x - mu) * lax.rsqrt(var + 1e-5) * g[None, :, None, None]
            + be[None, :, None, None])

  h = jax.nn.relu(bn(conv(obs, p["c1_w"], p["c1_b"]), p["bn1_g"], p["bn1_b"]))
  h = jax.nn.relu(bn(conv(h, p["c2_w"], p["c2_b"]), p["bn2_g"], p["bn2_b"]))
  h = jax.nn.relu(bn(conv(h, p["c3_w"], p["c3_b"]), p["bn3_g"], p["bn3_b"]))
  h = jax.nn.sigmoid(conv(h, p["c4_w"], p["c4_b"]))
  B, K, H, W = h.shape
  x = h.reshape(B * K, H * W)
  x = jax.nn.relu(x @ p["w1"] + p["b1"])
  x2 = x @ p["w2"] + p["b2"]
  mu = jnp.mean(x2, -1, keepdims=True)
  var = jnp.mean((x2 - mu) ** 2, -1, keepdims=True)
  x2 = jax.nn.relu((x2 - mu) * lax.rsqrt(var + 1e-5) * p["ln_g"] + p["ln_b"])
  out = x2 @ p["w3"] + p["b3"]
  return out.reshape(B, K, -1)


# -----------------------------------------------------------------------------
if __name__ == "__main__":
  # ContrastiveSWM config (encoder='large'):
  #   input_dims=(3,16,16), hidden_dim=64 (-> CNN hidden = 64//16 = 4),
  #   num_objects=4, embedding_dim=8, batch=2
  batch, C, HW = 2, 3, 16
  hidden_dim, num_objects, embedding_dim = 64, 4, 8

  key = jax.random.PRNGKey(0)
  k_obs, k_par = jax.random.split(key)
  obs = jax.random.normal(k_obs, (batch, C, HW, HW), dtype=jnp.float32)
  params = init_params(k_par, C, hidden_dim, num_objects, embedding_dim, HW)

  packed = pack_params(params)                 # one-time host-side re-layout
  fwd = jax.jit(functools.partial(cswm_forward, K=num_objects,
                                  E=embedding_dim, CP=CIN_PAD))
  state = jax.block_until_ready(fwd(obs, packed))

  ref = jax.block_until_ready(reference_forward(obs, params))
  assert state.shape == (batch, num_objects, embedding_dim), state.shape
  max_diff = float(jnp.max(jnp.abs(state - ref)))
  assert np.isfinite(max_diff) and max_diff < 1e-2, f"max diff {max_diff}"

  print("KERNEL_OK")
</pallas_src>

<mosaic_0001>
module attributes {stable_mosaic.version = 11 : i64} {
  func.func @_cswm_fused_kernel(%arg0: i32, %arg1: memref<6x256xf32, #tpu.memory_space<vmem>>, %arg2: memref<72x512xf32, #tpu.memory_space<vmem>>, %arg3: memref<32x72xf32, #tpu.memory_space<vmem>>, %arg4: memref<8x8xf32, #tpu.memory_space<vmem>>, %arg5: memref<256x64xf32, #tpu.memory_space<vmem>>, %arg6: memref<64x64xf32, #tpu.memory_space<vmem>>, %arg7: memref<64x8xf32, #tpu.memory_space<vmem>>, %arg8: memref<5x64xf32, #tpu.memory_space<vmem>>, %arg9: memref<8x8xf32, #tpu.memory_space<vmem>>) attributes {dimension_semantics = [#tpu.dimension_semantics<arbitrary>], iteration_bounds = array<i64: 1>, scalar_prefetch = 0 : i64, scratch_operands = 0 : i64, tpu.core_type = #tpu.core_type<tc>, window_params = [{pipeline_mode = #tpu.pipeline_mode<synchronous>, transform_indices = @transform_0, window_bounds = array<i64: 6, 256>}, {pipeline_mode = #tpu.pipeline_mode<synchronous>, transform_indices = @transform_1, window_bounds = array<i64: 72, 512>}, {pipeline_mode = #tpu.pipeline_mode<synchronous>, transform_indices = @transform_2, window_bounds = array<i64: 32, 72>}, {pipeline_mode = #tpu.pipeline_mode<synchronous>, transform_indices = @transform_3, window_bounds = array<i64: 8, 8>}, {pipeline_mode = #tpu.pipeline_mode<synchronous>, transform_indices = @transform_4, window_bounds = array<i64: 256, 64>}, {pipeline_mode = #tpu.pipeline_mode<synchronous>, transform_indices = @transform_5, window_bounds = array<i64: 64, 64>}, {pipeline_mode = #tpu.pipeline_mode<synchronous>, transform_indices = @transform_6, window_bounds = array<i64: 64, 8>}, {pipeline_mode = #tpu.pipeline_mode<synchronous>, transform_indices = @transform_7, window_bounds = array<i64: 5, 64>}, {pipeline_mode = #tpu.pipeline_mode<synchronous>, transform_indices = @transform_8, window_bounds = array<i64: 8, 8>}]} {
    %c0 = arith.constant 0 : index
    %c0_0 = arith.constant 0 : index
    %0 = vector.load %arg2[%c0, %c0_0] : memref<72x512xf32, #tpu.memory_space<vmem>>, vector<72x512xf32>
    %c0_1 = arith.constant 0 : index
    %c0_2 = arith.constant 0 : index
    %1 = vector.load %arg3[%c0_1, %c0_2] : memref<32x72xf32, #tpu.memory_space<vmem>>, vector<32x72xf32>
    %c0_3 = arith.constant 0 : index
    %c0_4 = arith.constant 0 : index
    %2 = vector.load %arg4[%c0_3, %c0_4] : memref<8x8xf32, #tpu.memory_space<vmem>>, vector<8x8xf32>
    %c0_5 = arith.constant 0 : index
    %c0_6 = arith.constant 0 : index
    %3 = vector.load %arg8[%c0_5, %c0_6] : memref<5x64xf32, #tpu.memory_space<vmem>>, vector<5x64xf32>
    %c0_7 = arith.constant 0 : index
    %c0_8 = arith.constant 0 : index
    %4 = vector.load %arg1[%c0_7, %c0_8] : memref<6x256xf32, #tpu.memory_space<vmem>>, vector<6x256xf32>
    %cst = arith.constant 0.000000e+00 : f32
    %5 = vector.broadcast %cst : f32 to vector<5x256xf32>
    %6 = vector.extract_strided_slice %4 {offsets = [0, 0], sizes = [3, 256], strides = [1, 1]} : vector<6x256xf32> to vector<3x256xf32>
    %7 = tpu.concatenate %6, %5 in 0 : vector<3x256xf32>, vector<5x256xf32> -> vector<8x256xf32>
    %8 = vector.extract_strided_slice %4 {offsets = [3, 0], sizes = [3, 256], strides = [1, 1]} : vector<6x256xf32> to vector<3x256xf32>
    %9 = tpu.concatenate %8, %5 in 0 : vector<3x256xf32>, vector<5x256xf32> -> vector<8x256xf32>
    %10 = tpu.concatenate %7, %9 in 1 : vector<8x256xf32>, vector<8x256xf32> -> vector<8x512xf32>
    %11 = vector.extract_strided_slice %1 {offsets = [0, 0], sizes = [8, 72], strides = [1, 1]} : vector<32x72xf32> to vector<8x72xf32>
    %c17_i32 = arith.constant 17 : i32
    %12 = tpu.dynamic_rotate %10 by %c17_i32 dim 1 : vector<8x512xf32>, i32 -> vector<8x512xf32>
    %c16_i32 = arith.constant 16 : i32
    %13 = tpu.dynamic_rotate %10 by %c16_i32 dim 1 : vector<8x512xf32>, i32 -> vector<8x512xf32>
    %c15_i32 = arith.constant 15 : i32
    %14 = tpu.dynamic_rotate %10 by %c15_i32 dim 1 : vector<8x512xf32>, i32 -> vector<8x512xf32>
    %c1_i32 = arith.constant 1 : i32
    %15 = tpu.dynamic_rotate %10 by %c1_i32 dim 1 : vector<8x512xf32>, i32 -> vector<8x512xf32>
    %c511_i32 = arith.constant 511 : i32
    %16 = tpu.dynamic_rotate %10 by %c511_i32 dim 1 : vector<8x512xf32>, i32 -> vector<8x512xf32>
    %c497_i32 = arith.constant 497 : i32
    %17 = tpu.dynamic_rotate %10 by %c497_i32 dim 1 : vector<8x512xf32>, i32 -> vector<8x512xf32>
    %c496_i32 = arith.constant 496 : i32
    %18 = tpu.dynamic_rotate %10 by %c496_i32 dim 1 : vector<8x512xf32>, i32 -> vector<8x512xf32>
    %c495_i32 = arith.constant 495 : i32
    %19 = tpu.dynamic_rotate %10 by %c495_i32 dim 1 : vector<8x512xf32>, i32 -> vector<8x512xf32>
    %20 = tpu.concatenate %12, %13, %14, %15, %10, %16, %17, %18, %19 in 0 : vector<8x512xf32>, vector<8x512xf32>, vector<8x512xf32>, vector<8x512xf32>, vector<8x512xf32>, vector<8x512xf32>, vector<8x512xf32>, vector<8x512xf32>, vector<8x512xf32> -> vector<72x512xf32>
    %21 = arith.mulf %20, %0 : vector<72x512xf32>
    %cst_9 = arith.constant dense<0.000000e+00> : vector<8x512xf32>
    %22 = tpu.matmul %11, %21, %cst_9 {dimension_numbers = #tpu.dot_dimension_numbers<[1], [0], [0], [1], [0, 0, 1, 1], [], []>} : vector<8x72xf32>, vector<72x512xf32>, vector<8x512xf32> -> vector<8x512xf32>
    %23 = vector.extract_strided_slice %2 {offsets = [0, 0], sizes = [8, 1], strides = [1, 1]} : vector<8x8xf32> to vector<8x1xf32>
    %24 = vector.extract_strided_slice %2 {offsets = [0, 1], sizes = [8, 1], strides = [1, 1]} : vector<8x8xf32> to vector<8x1xf32>
    %25 = arith.mulf %22, %22 : vector<8x512xf32>
    %26 = tpu.concatenate %22, %25 in 0 : vector<8x512xf32>, vector<8x512xf32> -> vector<16x512xf32>
    %cst_10 = arith.constant dense<0.000000e+00> : vector<16xf32>
    %27 = vector.multi_reduction <add>, %26, %cst_10 [1] : vector<16x512xf32> to vector<16xf32>
    %28 = vector.shape_cast %27 : vector<16xf32> to vector<16x1xf32>
    %cst_11 = arith.constant 0.001953125 : f32
    %29 = vector.broadcast %cst_11 : f32 to vector<16x1xf32>
    %30 = arith.mulf %28, %29 : vector<16x1xf32>
    %31 = vector.extract_strided_slice %30 {offsets = [0, 0], sizes = [8, 1], strides = [1, 1]} : vector<16x1xf32> to vector<8x1xf32>
    %32 = vector.extract_strided_slice %30 {offsets = [8, 0], sizes = [8, 1], strides = [1, 1]} : vector<16x1xf32> to vector<8x1xf32>
    %33 = arith.mulf %31, %31 : vector<8x1xf32>
    %34 = arith.subf %32, %33 : vector<8x1xf32>
    %cst_12 = arith.constant 0.000000e+00 : f32
    %35 = vector.broadcast %cst_12 : f32 to vector<8x1xf32>
    %36 = arith.maximumf %34, %35 : vector<8x1xf32>
    %cst_13 = arith.constant 9.99999974E-6 : f32
    %37 = vector.broadcast %cst_13 : f32 to vector<8x1xf32>
    %38 = arith.addf %36, %37 : vector<8x1xf32>
    %39 = math.rsqrt %38 : vector<8x1xf32>
    %40 = arith.mulf %23, %39 : vector<8x1xf32>
    %41 = arith.mulf %31, %40 : vector<8x1xf32>
    %42 = arith.subf %24, %41 : vector<8x1xf32>
    %43 = vector.broadcast %40 : vector<8x1xf32> to vector<8x512xf32>
    %44 = arith.mulf %22, %43 : vector<8x512xf32>
    %45 = vector.broadcast %42 : vector<8x1xf32> to vector<8x512xf32>
    %46 = arith.addf %44, %45 : vector<8x512xf32>
    %cst_14 = arith.constant 0.000000e+00 : f32
    %47 = vector.broadcast %cst_14 : f32 to vector<8x512xf32>
    %48 = arith.maximumf %46, %47 : vector<8x512xf32>
    %49 = vector.extract_strided_slice %1 {offsets = [8, 0], sizes = [8, 72], strides = [1, 1]} : vector<32x72xf32> to vector<8x72xf32>
    %c17_i32_15 = arith.constant 17 : i32
    %50 = tpu.dynamic_rotate %48 by %c17_i32_15 dim 1 : vector<8x512xf32>, i32 -> vector<8x512xf32>
    %c16_i32_16 = arith.constant 16 : i32
    %51 = tpu.dynamic_rotate %48 by %c16_i32_16 dim 1 : vector<8x512xf32>, i32 -> vector<8x512xf32>
    %c15_i32_17 = arith.constant 15 : i32
    %52 = tpu.dynamic_rotate %48 by %c15_i32_17 dim 1 : vector<8x512xf32>, i32 -> vector<8x512xf32>
    %c1_i32_18 = arith.constant 1 : i32
    %53 = tpu.dynamic_rotate %48 by %c1_i32_18 dim 1 : vector<8x512xf32>, i32 -> vector<8x512xf32>
    %c511_i32_19 = arith.constant 511 : i32
    %54 = tpu.dynamic_rotate %48 by %c511_i32_19 dim 1 : vector<8x512xf32>, i32 -> vector<8x512xf32>
    %c497_i32_20 = arith.constant 497 : i32
    %55 = tpu.dynamic_rotate %48 by %c497_i32_20 dim 1 : vector<8x512xf32>, i32 -> vector<8x512xf32>
    %c496_i32_21 = arith.constant 496 : i32
    %56 = tpu.dynamic_rotate %48 by %c496_i32_21 dim 1 : vector<8x512xf32>, i32 -> vector<8x512xf32>
    %c495_i32_22 = arith.constant 495 : i32
    %57 = tpu.dynamic_rotate %48 by %c495_i32_22 dim 1 : vector<8x512xf32>, i32 -> vector<8x512xf32>
    %58 = tpu.concatenate %50, %51, %52, %53, %48, %54, %55, %56, %57 in 0 : vector<8x512xf32>, vector<8x512xf32>, vector<8x512xf32>, vector<8x512xf32>, vector<8x512xf32>, vector<8x512xf32>, vector<8x512xf32>, vector<8x512xf32>, vector<8x512xf32> -> vector<72x512xf32>
    %59 = arith.mulf %58, %0 : vector<72x512xf32>
    %cst_23 = arith.constant dense<0.000000e+00> : vector<8x512xf32>
    %60 = tpu.matmul %49, %59, %cst_23 {dimension_numbers = #tpu.dot_dimension_numbers<[1], [0], [0], [1], [0, 0, 1, 1], [], []>} : vector<8x72xf32>, vector<72x512xf32>, vector<8x512xf32> -> vector<8x512xf32>
    %61 = vector.extract_strided_slice %2 {offsets = [0, 2], sizes = [8, 1], strides = [1, 1]} : vector<8x8xf32> to vector<8x1xf32>
    %62 = vector.extract_strided_slice %2 {offsets = [0, 3], sizes = [8, 1], strides = [1, 1]} : vector<8x8xf32> to vector<8x1xf32>
    %63 = arith.mulf %60, %60 : vector<8x512xf32>
    %64 = tpu.concatenate %60, %63 in 0 : vector<8x512xf32>, vector<8x512xf32> -> vector<16x512xf32>
    %cst_24 = arith.constant dense<0.000000e+00> : vector<16xf32>
    %65 = vector.multi_reduction <add>, %64, %cst_24 [1] : vector<16x512xf32> to vector<16xf32>
    %66 = vector.shape_cast %65 : vector<16xf32> to vector<16x1xf32>
    %cst_25 = arith.constant 0.001953125 : f32
    %67 = vector.broadcast %cst_25 : f32 to vector<16x1xf32>
    %68 = arith.mulf %66, %67 : vector<16x1xf32>
    %69 = vector.extract_strided_slice %68 {offsets = [0, 0], sizes = [8, 1], strides = [1, 1]} : vector<16x1xf32> to vector<8x1xf32>
    %70 = vector.extract_strided_slice %68 {offsets = [8, 0], sizes = [8, 1], strides = [1, 1]} : vector<16x1xf32> to vector<8x1xf32>
    %71 = arith.mulf %69, %69 : vector<8x1xf32>
    %72 = arith.subf %70, %71 : vector<8x1xf32>
    %cst_26 = arith.constant 0.000000e+00 : f32
    %73 = vector.broadcast %cst_26 : f32 to vector<8x1xf32>
    %74 = arith.maximumf %72, %73 : vector<8x1xf32>
    %cst_27 = arith.constant 9.99999974E-6 : f32
    %75 = vector.broadcast %cst_27 : f32 to vector<8x1xf32>
    %76 = arith.addf %74, %75 : vector<8x1xf32>
    %77 = math.rsqrt %76 : vector<8x1xf32>
    %78 = arith.mulf %61, %77 : vector<8x1xf32>
    %79 = arith.mulf %69, %78 : vector<8x1xf32>
    %80 = arith.subf %62, %79 : vector<8x1xf32>
    %81 = vector.broadcast %78 : vector<8x1xf32> to vector<8x512xf32>
    %82 = arith.mulf %60, %81 : vector<8x512xf32>
    %83 = vector.broadcast %80 : vector<8x1xf32> to vector<8x512xf32>
    %84 = arith.addf %82, %83 : vector<8x512xf32>
    %cst_28 = arith.constant 0.000000e+00 : f32
    %85 = vector.broadcast %cst_28 : f32 to vector<8x512xf32>
    %86 = arith.maximumf %84, %85 : vector<8x512xf32>
    %87 = vector.extract_strided_slice %1 {offsets = [16, 0], sizes = [8, 72], strides = [1, 1]} : vector<32x72xf32> to vector<8x72xf32>
    %c17_i32_29 = arith.constant 17 : i32
    %88 = tpu.dynamic_rotate %86 by %c17_i32_29 dim 1 : vector<8x512xf32>, i32 -> vector<8x512xf32>
    %c16_i32_30 = arith.constant 16 : i32
    %89 = tpu.dynamic_rotate %86 by %c16_i32_30 dim 1 : vector<8x512xf32>, i32 -> vector<8x512xf32>
    %c15_i32_31 = arith.constant 15 : i32
    %90 = tpu.dynamic_rotate %86 by %c15_i32_31 dim 1 : vector<8x512xf32>, i32 -> vector<8x512xf32>
    %c1_i32_32 = arith.constant 1 : i32
    %91 = tpu.dynamic_rotate %86 by %c1_i32_32 dim 1 : vector<8x512xf32>, i32 -> vector<8x512xf32>
    %c511_i32_33 = arith.constant 511 : i32
    %92 = tpu.dynamic_rotate %86 by %c511_i32_33 dim 1 : vector<8x512xf32>, i32 -> vector<8x512xf32>
    %c497_i32_34 = arith.constant 497 : i32
    %93 = tpu.dynamic_rotate %86 by %c497_i32_34 dim 1 : vector<8x512xf32>, i32 -> vector<8x512xf32>
    %c496_i32_35 = arith.constant 496 : i32
    %94 = tpu.dynamic_rotate %86 by %c496_i32_35 dim 1 : vector<8x512xf32>, i32 -> vector<8x512xf32>
    %c495_i32_36 = arith.constant 495 : i32
    %95 = tpu.dynamic_rotate %86 by %c495_i32_36 dim 1 : vector<8x512xf32>, i32 -> vector<8x512xf32>
    %96 = tpu.concatenate %88, %89, %90, %91, %86, %92, %93, %94, %95 in 0 : vector<8x512xf32>, vector<8x512xf32>, vector<8x512xf32>, vector<8x512xf32>, vector<8x512xf32>, vector<8x512xf32>, vector<8x512xf32>, vector<8x512xf32>, vector<8x512xf32> -> vector<72x512xf32>
    %97 = arith.mulf %96, %0 : vector<72x512xf32>
    %cst_37 = arith.constant dense<0.000000e+00> : vector<8x512xf32>
    %98 = tpu.matmul %87, %97, %cst_37 {dimension_numbers = #tpu.dot_dimension_numbers<[1], [0], [0], [1], [0, 0, 1, 1], [], []>} : vector<8x72xf32>, vector<72x512xf32>, vector<8x512xf32> -> vector<8x512xf32>
    %99 = vector.extract_strided_slice %2 {offsets = [0, 4], sizes = [8, 1], strides = [1, 1]} : vector<8x8xf32> to vector<8x1xf32>
    %100 = vector.extract_strided_slice %2 {offsets = [0, 5], sizes = [8, 1], strides = [1, 1]} : vector<8x8xf32> to vector<8x1xf32>
    %101 = arith.mulf %98, %98 : vector<8x512xf32>
    %102 = tpu.concatenate %98, %101 in 0 : vector<8x512xf32>, vector<8x512xf32> -> vector<16x512xf32>
    %cst_38 = arith.constant dense<0.000000e+00> : vector<16xf32>
    %103 = vector.multi_reduction <add>, %102, %cst_38 [1] : vector<16x512xf32> to vector<16xf32>
    %104 = vector.shape_cast %103 : vector<16xf32> to vector<16x1xf32>
    %cst_39 = arith.constant 0.001953125 : f32
    %105 = vector.broadcast %cst_39 : f32 to vector<16x1xf32>
    %106 = arith.mulf %104, %105 : vector<16x1xf32>
    %107 = vector.extract_strided_slice %106 {offsets = [0, 0], sizes = [8, 1], strides = [1, 1]} : vector<16x1xf32> to vector<8x1xf32>
    %108 = vector.extract_strided_slice %106 {offsets = [8, 0], sizes = [8, 1], strides = [1, 1]} : vector<16x1xf32> to vector<8x1xf32>
    %109 = arith.mulf %107, %107 : vector<8x1xf32>
    %110 = arith.subf %108, %109 : vector<8x1xf32>
    %cst_40 = arith.constant 0.000000e+00 : f32
    %111 = vector.broadcast %cst_40 : f32 to vector<8x1xf32>
    %112 = arith.maximumf %110, %111 : vector<8x1xf32>
    %cst_41 = arith.constant 9.99999974E-6 : f32
    %113 = vector.broadcast %cst_41 : f32 to vector<8x1xf32>
    %114 = arith.addf %112, %113 : vector<8x1xf32>
    %115 = math.rsqrt %114 : vector<8x1xf32>
    %116 = arith.mulf %99, %115 : vector<8x1xf32>
    %117 = arith.mulf %107, %116 : vector<8x1xf32>
    %118 = arith.subf %100, %117 : vector<8x1xf32>
    %119 = vector.broadcast %116 : vector<8x1xf32> to vector<8x512xf32>
    %120 = arith.mulf %98, %119 : vector<8x512xf32>
    %121 = vector.broadcast %118 : vector<8x1xf32> to vector<8x512xf32>
    %122 = arith.addf %120, %121 : vector<8x512xf32>
    %cst_42 = arith.constant 0.000000e+00 : f32
    %123 = vector.broadcast %cst_42 : f32 to vector<8x512xf32>
    %124 = arith.maximumf %122, %123 : vector<8x512xf32>
    %125 = vector.extract_strided_slice %1 {offsets = [24, 0], sizes = [4, 72], strides = [1, 1]} : vector<32x72xf32> to vector<4x72xf32>
    %c17_i32_43 = arith.constant 17 : i32
    %126 = tpu.dynamic_rotate %124 by %c17_i32_43 dim 1 : vector<8x512xf32>, i32 -> vector<8x512xf32>
    %c16_i32_44 = arith.constant 16 : i32
    %127 = tpu.dynamic_rotate %124 by %c16_i32_44 dim 1 : vector<8x512xf32>, i32 -> vector<8x512xf32>
    %c15_i32_45 = arith.constant 15 : i32
    %128 = tpu.dynamic_rotate %124 by %c15_i32_45 dim 1 : vector<8x512xf32>, i32 -> vector<8x512xf32>
    %c1_i32_46 = arith.constant 1 : i32
    %129 = tpu.dynamic_rotate %124 by %c1_i32_46 dim 1 : vector<8x512xf32>, i32 -> vector<8x512xf32>
    %c511_i32_47 = arith.constant 511 : i32
    %130 = tpu.dynamic_rotate %124 by %c511_i32_47 dim 1 : vector<8x512xf32>, i32 -> vector<8x512xf32>
    %c497_i32_48 = arith.constant 497 : i32
    %131 = tpu.dynamic_rotate %124 by %c497_i32_48 dim 1 : vector<8x512xf32>, i32 -> vector<8x512xf32>
    %c496_i32_49 = arith.constant 496 : i32
    %132 = tpu.dynamic_rotate %124 by %c496_i32_49 dim 1 : vector<8x512xf32>, i32 -> vector<8x512xf32>
    %c495_i32_50 = arith.constant 495 : i32
    %133 = tpu.dynamic_rotate %124 by %c495_i32_50 dim 1 : vector<8x512xf32>, i32 -> vector<8x512xf32>
    %134 = tpu.concatenate %126, %127, %128, %129, %124, %130, %131, %132, %133 in 0 : vector<8x512xf32>, vector<8x512xf32>, vector<8x512xf32>, vector<8x512xf32>, vector<8x512xf32>, vector<8x512xf32>, vector<8x512xf32>, vector<8x512xf32>, vector<8x512xf32> -> vector<72x512xf32>
    %135 = arith.mulf %134, %0 : vector<72x512xf32>
    %cst_51 = arith.constant dense<0.000000e+00> : vector<4x512xf32>
    %136 = tpu.matmul %125, %135, %cst_51 {dimension_numbers = #tpu.dot_dimension_numbers<[1], [0], [0], [1], [0, 0, 1, 1], [], []>} : vector<4x72xf32>, vector<72x512xf32>, vector<4x512xf32> -> vector<4x512xf32>
    %137 = vector.extract_strided_slice %2 {offsets = [0, 6], sizes = [4, 1], strides = [1, 1]} : vector<8x8xf32> to vector<4x1xf32>
    %138 = vector.broadcast %137 : vector<4x1xf32> to vector<4x512xf32>
    %139 = arith.addf %136, %138 : vector<4x512xf32>
    %140 = arith.negf %139 : vector<4x512xf32>
    %141 = math.exp %140 : vector<4x512xf32>
    %cst_52 = arith.constant 1.000000e+00 : f32
    %142 = vector.broadcast %cst_52 : f32 to vector<4x512xf32>
    %143 = arith.addf %142, %141 : vector<4x512xf32>
    %144 = arith.divf %142, %143 : vector<4x512xf32>
    %145 = vector.extract_strided_slice %144 {offsets = [0, 0], sizes = [4, 256], strides = [1, 1]} : vector<4x512xf32> to vector<4x256xf32>
    %146 = vector.extract_strided_slice %144 {offsets = [0, 256], sizes = [4, 256], strides = [1, 1]} : vector<4x512xf32> to vector<4x256xf32>
    %147 = tpu.concatenate %145, %146 in 0 : vector<4x256xf32>, vector<4x256xf32> -> vector<8x256xf32>
    %c0_53 = arith.constant 0 : index
    %c0_54 = arith.constant 0 : index
    %148 = vector.load %arg5[%c0_53, %c0_54] : memref<256x64xf32, #tpu.memory_space<vmem>>, vector<256x64xf32>
    %cst_55 = arith.constant dense<0.000000e+00> : vector<8x64xf32>
    %149 = tpu.matmul %147, %148, %cst_55 {dimension_numbers = #tpu.dot_dimension_numbers<[1], [0], [0], [1], [0, 0, 1, 1], [], []>} : vector<8x256xf32>, vector<256x64xf32>, vector<8x64xf32> -> vector<8x64xf32>
    %150 = vector.extract_strided_slice %3 {offsets = [0, 0], sizes = [1, 64], strides = [1, 1]} : vector<5x64xf32> to vector<1x64xf32>
    %151 = vector.broadcast %150 : vector<1x64xf32> to vector<8x64xf32>
    %152 = arith.addf %149, %151 : vector<8x64xf32>
    %cst_56 = arith.constant 0.000000e+00 : f32
    %153 = vector.broadcast %cst_56 : f32 to vector<8x64xf32>
    %154 = arith.maximumf %152, %153 : vector<8x64xf32>
    %c0_57 = arith.constant 0 : index
    %c0_58 = arith.constant 0 : index
    %155 = vector.load %arg6[%c0_57, %c0_58] : memref<64x64xf32, #tpu.memory_space<vmem>>, vector<64x64xf32>
    %cst_59 = arith.constant dense<0.000000e+00> : vector<8x64xf32>
    %156 = tpu.matmul %154, %155, %cst_59 {dimension_numbers = #tpu.dot_dimension_numbers<[1], [0], [0], [1], [0, 0, 1, 1], [], []>} : vector<8x64xf32>, vector<64x64xf32>, vector<8x64xf32> -> vector<8x64xf32>
    %157 = vector.extract_strided_slice %3 {offsets = [1, 0], sizes = [1, 64], strides = [1, 1]} : vector<5x64xf32> to vector<1x64xf32>
    %158 = vector.broadcast %157 : vector<1x64xf32> to vector<8x64xf32>
    %159 = arith.addf %156, %158 : vector<8x64xf32>
    %cst_60 = arith.constant dense<0.000000e+00> : vector<8xf32>
    %160 = vector.multi_reduction <add>, %159, %cst_60 [1] : vector<8x64xf32> to vector<8xf32>
    %161 = vector.shape_cast %160 : vector<8xf32> to vector<8x1xf32>
    %cst_61 = arith.constant 6.400000e+01 : f32
    %162 = vector.broadcast %cst_61 : f32 to vector<8x1xf32>
    %163 = arith.divf %161, %162 : vector<8x1xf32>
    %164 = vector.broadcast %163 : vector<8x1xf32> to vector<8x64xf32>
    %165 = arith.subf %159, %164 : vector<8x64xf32>
    %166 = arith.mulf %165, %165 : vector<8x64xf32>
    %cst_62 = arith.constant dense<0.000000e+00> : vector<8xf32>
    %167 = vector.multi_reduction <add>, %166, %cst_62 [1] : vector<8x64xf32> to vector<8xf32>
    %168 = vector.shape_cast %167 : vector<8xf32> to vector<8x1xf32>
    %cst_63 = arith.constant 6.400000e+01 : f32
    %169 = vector.broadcast %cst_63 : f32 to vector<8x1xf32>
    %170 = arith.divf %168, %169 : vector<8x1xf32>
    %171 = vector.broadcast %163 : vector<8x1xf32> to vector<8x64xf32>
    %172 = arith.subf %159, %171 : vector<8x64xf32>
    %cst_64 = arith.constant 9.99999974E-6 : f32
    %173 = vector.broadcast %cst_64 : f32 to vector<8x1xf32>
    %174 = arith.addf %170, %173 : vector<8x1xf32>
    %175 = math.rsqrt %174 : vector<8x1xf32>
    %176 = vector.broadcast %175 : vector<8x1xf32> to vector<8x64xf32>
    %177 = arith.mulf %172, %176 : vector<8x64xf32>
    %178 = vector.extract_strided_slice %3 {offsets = [2, 0], sizes = [1, 64], strides = [1, 1]} : vector<5x64xf32> to vector<1x64xf32>
    %179 = vector.broadcast %178 : vector<1x64xf32> to vector<8x64xf32>
    %180 = arith.mulf %177, %179 : vector<8x64xf32>
    %181 = vector.extract_strided_slice %3 {offsets = [3, 0], sizes = [1, 64], strides = [1, 1]} : vector<5x64xf32> to vector<1x64xf32>
    %182 = vector.broadcast %181 : vector<1x64xf32> to vector<8x64xf32>
    %183 = arith.addf %180, %182 : vector<8x64xf32>
    %cst_65 = arith.constant 0.000000e+00 : f32
    %184 = vector.broadcast %cst_65 : f32 to vector<8x64xf32>
    %185 = arith.maximumf %183, %184 : vector<8x64xf32>
    %c0_66 = arith.constant 0 : index
    %c0_67 = arith.constant 0 : index
    %186 = vector.load %arg7[%c0_66, %c0_67] : memref<64x8xf32, #tpu.memory_space<vmem>>, vector<64x8xf32>
    %cst_68 = arith.constant dense<0.000000e+00> : vector<8x8xf32>
    %187 = tpu.matmul %185, %186, %cst_68 {dimension_numbers = #tpu.dot_dimension_numbers<[1], [0], [0], [1], [0, 0, 1, 1], [], []>} : vector<8x64xf32>, vector<64x8xf32>, vector<8x8xf32> -> vector<8x8xf32>
    %188 = vector.extract_strided_slice %3 {offsets = [4, 0], sizes = [1, 8], strides = [1, 1]} : vector<5x64xf32> to vector<1x8xf32>
    %189 = vector.broadcast %188 : vector<1x8xf32> to vector<8x8xf32>
    %190 = arith.addf %187, %189 : vector<8x8xf32>
    %c0_69 = arith.constant 0 : index
    %c0_70 = arith.constant 0 : index
    %191 = vector.load %arg9[%c0_69, %c0_70] : memref<8x8xf32, #tpu.memory_space<vmem>>, vector<8x8xf32>
    tpu.vector_store %arg9[%c0_69, %c0_70], %190 {strides = array<i32>} : memref<8x8xf32, #tpu.memory_space<vmem>>, vector<8x8xf32>,
    return
  }
  func.func @transform_0(%arg0: i32) -> (i32, i32) {
    %c0_i32 = arith.constant 0 : i32
    %c0_i32_0 = arith.constant 0 : i32
    %c0_i32_1 = arith.constant 0 : i32
    return %c0_i32, %c0_i32_0 : i32, i32
  }
  func.func @transform_1(%arg0: i32) -> (i32, i32) {
    %c0_i32 = arith.constant 0 : i32
    %c0_i32_0 = arith.constant 0 : i32
    %c0_i32_1 = arith.constant 0 : i32
    return %c0_i32, %c0_i32_0 : i32, i32
  }
  func.func @transform_2(%arg0: i32) -> (i32, i32) {
    %c0_i32 = arith.constant 0 : i32
    %c0_i32_0 = arith.constant 0 : i32
    %c0_i32_1 = arith.constant 0 : i32
    return %c0_i32, %c0_i32_0 : i32, i32
  }
  func.func @transform_3(%arg0: i32) -> (i32, i32) {
    %c0_i32 = arith.constant 0 : i32
    %c0_i32_0 = arith.constant 0 : i32
    %c0_i32_1 = arith.constant 0 : i32
    return %c0_i32, %c0_i32_0 : i32, i32
  }
  func.func @transform_4(%arg0: i32) -> (i32, i32) {
    %c0_i32 = arith.constant 0 : i32
    %c0_i32_0 = arith.constant 0 : i32
    %c0_i32_1 = arith.constant 0 : i32
    return %c0_i32, %c0_i32_0 : i32, i32
  }
  func.func @transform_5(%arg0: i32) -> (i32, i32) {
    %c0_i32 = arith.constant 0 : i32
    %c0_i32_0 = arith.constant 0 : i32
    %c0_i32_1 = arith.constant 0 : i32
    return %c0_i32, %c0_i32_0 : i32, i32
  }
  func.func @transform_6(%arg0: i32) -> (i32, i32) {
    %c0_i32 = arith.constant 0 : i32
    %c0_i32_0 = arith.constant 0 : i32
    %c0_i32_1 = arith.constant 0 : i32
    return %c0_i32, %c0_i32_0 : i32, i32
  }
  func.func @transform_7(%arg0: i32) -> (i32, i32) {
    %c0_i32 = arith.constant 0 : i32
    %c0_i32_0 = arith.constant 0 : i32
    %c0_i32_1 = arith.constant 0 : i32
    return %c0_i32, %c0_i32_0 : i32, i32
  }
  func.func @transform_8(%arg0: i32) -> (i32, i32) {
    %c0_i32 = arith.constant 0 : i32
    %c0_i32_0 = arith.constant 0 : i32
    %c0_i32_1 = arith.constant 0 : i32
    return %c0_i32, %c0_i32_0 : i32, i32
  }
}

</mosaic_0001>

<bundles_post_ra>
// kernel: cswm_forward.1
= control target key start
LH: loop header
LB: loop body
LE: loop exit
PB: predicated region body
PF: predicated region fallthrough
CT: control target
= control target key end

     0   :  { %vm74_vm0 = vcmask 1042432   ;;  %s1550_s9 = smov 111   ;;  %s2878_s0 = inlined_call_operand.vmem [shape: f32[6,256], index: 0, kind: input, shape index: {}]   ;;  %s2879_s1 = inlined_call_operand.vmem [shape: f32[72,512], index: 1, kind: input, shape index: {}]   ;;  %s2880_s2 = inlined_call_operand.vmem [shape: f32[32,72], index: 2, kind: input, shape index: {}]   ;;  %s2881_s3 = inlined_call_operand.vmem [shape: f32[8,8], index: 3, kind: input, shape index: {}]   ;;  %s2882_s4 = inlined_call_operand.vmem [shape: f32[256,64], index: 4, kind: input, shape index: {}]   ;;  %s2883_s5 = inlined_call_operand.vmem [shape: f32[64,64], index: 5, kind: input, shape index: {}]   ;;  %s2884_s6 = inlined_call_operand.vmem [shape: f32[64,8], index: 6, kind: input, shape index: {}]   ;;  %s2885_s7 = inlined_call_operand.vmem [shape: f32[5,64], index: 7, kind: input, shape index: {}]   ;;  %s2886_s8 = inlined_call_operand.hbm [shape: f32[8,8], index: 8, kind: output, shape index: {}]  }
   0x1   :  { %v72_v0 = vld [vmem:[%s2878_s0] sm:$0x3f]  ;;  %v73_v3 = vld [vmem:[%s2878_s0 + $0x8] sm:$0x3f] }
   0x2   :  { %v79_v1 = vrot.slane %v72_v0, 3  ;;  %v1616_v2 = vsel %vm74_vm0, %v72_v0, 0.0 }
   0x3   :  { %178 = vrot.lane.b32.xlu2 %v1616_v2, %s1550_s9 }
   0x4   :  { %13 = vsyncpa [#allocation3], 0  ;;  %v1624_v4 = vsel %vm74_vm0, %v79_v1, 0.0  ;;  %s1551_s10 = smov 112   ;;  %v80_v5 = vrot.slane %v73_v3, 3  ;;  %s1552_s0 = smov 113   ;;  %v93_v10 = vlaneseq }
   0x5   :  { %169 = vrot.lane.b32.xlu1 %v1624_v4, %s1551_s10  ;;  %182 = vrot.lane.b32.xlu0 %v1624_v4, %s1550_s9  ;;  %v1640_v7 = vsel %vm74_vm0, %v73_v3, 0.0  ;;  %s1553_s11 = smov 127   ;;  %s1554_s12 = smov 1   ;;  %v1699_v12 = vld [vmem:[%s2879_s1 + $0x100] sm:$0xff]  ;;  %v1708_v16 = vld [vmem:[%s2879_s1 + $0x108] sm:$0xff]  ;;  %vm227_vm9 = vcmask 588800  }
   0x6   :  { %v1631_v6 = vsel %vm74_vm0, %v80_v5, 0.0  ;;  %s1555_s13 = smov 15   ;;  %s1556_s14 = smov 16   ;;  %v1694_v11 = vand.u32 127, %v93_v10  ;;  %v1717_v22 = vld [vmem:[%s2879_s1 + $0x110] sm:$0xff]  ;;  %v1722_v23 = vld [vmem:[%s2879_s1 + $0x118] sm:$0xff] }
   0x7   :  { %s1557_s15 = smov 17   ;;  %v1733_v29 = vld [vmem:[%s2879_s1 + $0xf0] sm:$0xff]  ;;  %v1747_v34 = vld [vmem:[%s2879_s1 + $0xf8] sm:$0xff]  ;;  %v1782_v53 = vld [vmem:[%s2879_s1 + $0xe0] sm:$0xff]  ;;  %s1405_s19 = sshll.u32 %s2886_s8, 4  ;;  %s1406_s19 = int_to_ptr.hbm [resolvable:$true] %s1405_s19 }
   0x8   :  { %vm186_vm1 = vcmp.lt.s32.totalorder %v1694_v11, 111  ;;  %vm173_vm2 = vcmp.lt.s32.totalorder %v1694_v11, 112  ;;  %vm160_vm3 = vcmp.lt.s32.totalorder %v1694_v11, 113  ;;  %v1742_v33 = vld [vmem:[%s2879_s1 + $0xd0] sm:$0xff]  ;;  %v1758_v40 = vld [vmem:[%s2879_s1 + $0xd8] sm:$0xff]  ;;  %vm147_vm4 = vcmp.lt.s32.totalorder %v1694_v11, 127 }
   0x9   :  { %v1767_v45 = vld [vmem:[%s2879_s1 + $0xb0] sm:$0xff]  ;;  %v1787_v54 = vld [vmem:[%s2879_s1 + $0xe8] sm:$0xff]  ;;  %v1792_v55 = vld [vmem:[%s2879_s1 + $0xb8] sm:$0xff]  ;;  %vm134_vm5 = vcmp.lt.s32.totalorder %v1694_v11, 1  ;;  %vm121_vm6 = vcmp.lt.s32.totalorder %v1694_v11, 15  ;;  %vm108_vm7 = vcmp.lt.s32.totalorder %v1694_v11, 16 }
   0xa   :  { %v1772_v46 = vld [vmem:[%s2879_s1 + $0x90] sm:$0xff]  ;;  %v1799_v59 = vld [vmem:[%s2879_s1 + $0x98] sm:$0xff]  ;;  %v1812_v0 = vld [vmem:[%s2879_s1 + $0xc0] sm:$0xff]  ;;  %vm95_vm8 = vcmp.lt.s32.totalorder %v1694_v11, 17 }
   0xb   :  { %156 = vrot.lane.b32.xlu2 %v1624_v4, %s1552_s0  ;;  %v209_v51 = vmul.f32 %v1624_v4, %v1772_v46  ;;  %v1817_v1 = vld [vmem:[%s2879_s1 + $0xc8] sm:$0xff]  ;;  %v1523_v11 = vld [vmem:[%s2879_s1] sm:$0xff] }
   0xd   :  { %171 = vrot.lane.b32.xlu1 %v1631_v6, %s1551_s10  ;;  %184 = vrot.lane.b32.xlu0 %v1631_v6, %s1550_s9 }
  0x13   :  { %180 = vrot.lane.b32.xlu2 %v1640_v7, %s1550_s9 }
  0x15   :  { %158 = vrot.lane.b32.xlu0 %v1631_v6, %s1552_s0  ;;  %165 = vrot.lane.b32.xlu1 %v1616_v2, %s1551_s10 }
  0x1b   :  { %152 = vrot.lane.b32.xlu2 %v1616_v2, %s1552_s0 }
  0x1d   :  { %143 = vrot.lane.b32.xlu0 %v1624_v4, %s1553_s11  ;;  %145 = vrot.lane.b32.xlu1 %v1631_v6, %s1553_s11 }
  0x23   :  { %154 = vrot.lane.b32.xlu2 %v1640_v7, %s1552_s0 }
  0x25   :  { %167 = vrot.lane.b32.xlu0 %v1640_v7, %s1551_s10  ;;  %139 = vrot.lane.b32.xlu1 %v1616_v2, %s1553_s11 }
  0x2b   :  { %141 = vrot.lane.b32.xlu2 %v1640_v7, %s1553_s11 }
  0x2d   :  { %128 = vrot.lane.b32.xlu0 %v1640_v7, %s1554_s12  ;;  %130 = vrot.lane.b32.xlu1 %v1624_v4, %s1554_s12 }
  0x33   :  { %132 = vrot.lane.b32.xlu2 %v1631_v6, %s1554_s12 }
  0x35   :  { %115 = vrot.lane.b32.xlu0 %v1640_v7, %s1555_s13  ;;  %117 = vrot.lane.b32.xlu1 %v1624_v4, %s1555_s13 }
  0x3b   :  { %119 = vrot.lane.b32.xlu2 %v1631_v6, %s1555_s13 }
  0x3d   :  { %102 = vrot.lane.b32.xlu0 %v1640_v7, %s1556_s14  ;;  %104 = vrot.lane.b32.xlu1 %v1624_v4, %s1556_s14 }
  0x43   :  { %89 = vrot.lane.b32.xlu2 %v1624_v4, %s1557_s15 }
  0x45   :  { %126 = vrot.lane.b32.xlu0 %v1616_v2, %s1554_s12  ;;  %87 = vrot.lane.b32.xlu1 %v1640_v7, %s1557_s15 }
  0x4b   :  { %91 = vrot.lane.b32.xlu2 %v1631_v6, %s1557_s15 }
  0x4d   :  { %106 = vrot.lane.b32.xlu0 %v1631_v6, %s1556_s14  ;;  %113 = vrot.lane.b32.xlu1 %v1616_v2, %s1555_s13 }
  0x55   :  { %100 = vrot.lane.b32.xlu0 %v1616_v2, %s1556_s14  ;;  %85 = vrot.lane.b32.xlu1 %v1616_v2, %s1557_s15 }
  0x5d   :  { %v179_v8 = vpop.permute.xlu2 %178 }
  0x65   :  { %v157_v9 = vpop.permute.xlu2 %156 }
  0x6d   :  { %v181_v13 = vpop.permute.xlu2 %180 }
  0x6e   :  { %v189_v14 = vsel %vm186_vm1, %v179_v8, %v181_v13 }
  0x6f   :  { %v223_v15 = vmul.f32 %v189_v14, %v1699_v12  ;;  %v210_v14 = vmul.f32 %v1631_v6, %v1799_v59 }
  0x71   :  { %238 = vmatpush.msra.mxu0 %v223_v15  ;;  %v1841_v15 = vld [vmem:[%s2879_s1 + $0x80] sm:$0xff] }
  0x75   :  { %v153_v21 = vpop.permute.xlu2 %152 }
  0x77   :  { %v170_v17 = vpop.permute.xlu1 %169  ;;  %v183_v18 = vpop.permute.xlu0 %182 }
  0x78   :  { %v188_v19 = vsel %vm186_vm1, %v181_v13, %v183_v18  ;;  %v1834_v13 = vld [vmem:[%s2879_s1 + $0xa0] sm:$0xff] }
  0x79   :  { %v224_v20 = vmul.f32 %v188_v19, %v1708_v16 }
  0x7b   :  { %258 = vmatpush.msra.mxu1 %v224_v20 }
  0x7d   :  { %v155_v41 = vpop.permute.xlu2 %154 }
  0x7e   :  { %v162_v56 = vsel %vm160_vm3, %v155_v41, %v157_v9  ;;  %v163_v60 = vsel %vm160_vm3, %v153_v21, %v155_v41 }
  0x7f   :  { %v172_v24 = vpop.permute.xlu1 %171  ;;  %v185_v25 = vpop.permute.xlu0 %184  ;;  %v216_v19 = vmul.f32 %v162_v56, %v1817_v1  ;;  %v1903_v56 = vld [vmem:[%s2879_s1 + $0x60] sm:$0xff] }
  0x80   :  { %v174_v26 = vsel %vm173_vm2, %v170_v17, %v172_v24  ;;  %v187_v27 = vsel %vm186_vm1, %v183_v18, %v185_v25  ;;  %v190_v28 = vsel %vm186_vm1, %v185_v25, %v179_v8  ;;  %v215_v18 = vmul.f32 %v163_v60, %v1812_v0 }
  0x81   :  { %v225_v30 = vmul.f32 %v187_v27, %v1717_v22  ;;  %v226_v31 = vmul.f32 %v190_v28, %v1722_v23  ;;  %v221_v32 = vmul.f32 %v174_v26, %v1733_v29  ;;  %v1860_v26 = vld [vmem:[%s2879_s1 + $0x70] sm:$0xff]  ;;  %v1865_v27 = vld [vmem:[%s2879_s1 + $0x78] sm:$0xff] }
  0x83   :  { %278 = vmatpush.msra.mxu2 %v225_v30  ;;  %298 = vmatpush.msra.mxu3 %v226_v31 }
  0x85   :  { %279 = vmatpush.msra.mxu2 %v221_v32  ;;  %v142_v52 = vpop.permute.xlu2 %141 }
  0x87   :  { %v159_v35 = vpop.permute.xlu0 %158  ;;  %v166_v36 = vpop.permute.xlu1 %165 }
  0x88   :  { %v161_v37 = vsel %vm160_vm3, %v157_v9, %v159_v35  ;;  %v164_v38 = vsel %vm160_vm3, %v159_v35, %v153_v21  ;;  %v177_v39 = vsel %vm173_vm2, %v172_v24, %v166_v36  ;;  %v1827_v9 = vld [vmem:[%s2879_s1 + $0xa8] sm:$0xff]  ;;  %v207_v24 = vmul.f32 %v1616_v2, %v1841_v15 }
  0x89   :  { %v217_v42 = vmul.f32 %v161_v37, %v1742_v33  ;;  %v222_v43 = vmul.f32 %v177_v39, %v1747_v34  ;;  %v218_v44 = vmul.f32 %v164_v38, %v1758_v40  ;;  %v1882_v37 = vld [vmem:[%s2879_s1 + $0x58] sm:$0xff] }
  0x8b   :  { %280 = vmatpush.msra.mxu2 %v217_v42  ;;  %299 = vmatpush.msra.mxu3 %v222_v43 }
  0x8d   :  { %300 = vmatpush.msra.mxu3 %v218_v44  ;;  %v133_v20 = vpop.permute.xlu2 %132 }
  0x8f   :  { %v144_v47 = vpop.permute.xlu0 %143  ;;  %v146_v48 = vpop.permute.xlu1 %145 }
  0x90   :  { %v148_v49 = vsel %vm147_vm4, %v144_v47, %v146_v48  ;;  %v149_v3 = vsel %vm147_vm4, %v142_v52, %v144_v47  ;;  %v1894_v47 = vld [vmem:[%s2879_s1 + $0x30] sm:$0xff] }
  0x91   :  { %v213_v50 = vmul.f32 %v148_v49, %v1767_v45  ;;  %v212_v6 = vmul.f32 %v149_v3, %v1827_v9 }
  0x93   :  { %281 = vmatpush.msra.mxu2 %v213_v50 }
  0x95   :  { %282 = vmatpush.msra.mxu2 %v209_v51  ;;  %v120_v35 = vpop.permute.xlu2 %119 }
  0x97   :  { %v168_v57 = vpop.permute.xlu0 %167  ;;  %v140_v58 = vpop.permute.xlu1 %139 }
  0x98   :  { %v175_v61 = vsel %vm173_vm2, %v168_v57, %v170_v17  ;;  %v176_v62 = vsel %vm173_vm2, %v166_v36, %v168_v57  ;;  %v151_v63 = vsel %vm147_vm4, %v146_v48, %v140_v58  ;;  %v150_v10 = vsel %vm147_vm4, %v140_v58, %v142_v52  ;;  %v1846_v17 = vld [vmem:[%s2879_s1 + $0x88] sm:$0xff]  ;;  %v1877_v36 = vld [vmem:[%s2879_s1 + $0x50] sm:$0xff] }
  0x99   :  { %v219_v4 = vmul.f32 %v176_v62, %v1782_v53  ;;  %v220_v5 = vmul.f32 %v175_v61, %v1787_v54  ;;  %v214_v8 = vmul.f32 %v151_v63, %v1792_v55  ;;  %v211_v21 = vmul.f32 %v150_v10, %v1834_v13  ;;  %v1908_v57 = vld [vmem:[%s2879_s1 + $0x68] sm:$0xff]  ;;  %v1913_v58 = vld [vmem:[%s2879_s1 + $0x10] sm:$0xff]  ;;  %v66_v10 = vld [vmem:[%s2880_s2] sm:$0xff] }
  0x9a   :  { %v208_v25 = vmul.f32 %v1640_v7, %v1846_v17 }
  0x9b   :  { %239 = vmatpush.msra.mxu0 %v219_v4  ;;  %259 = vmatpush.msra.mxu1 %v220_v5 }
  0x9c   :  { %301 = vmatpush.msra.mxu3 %v214_v8 }
  0x9d   :  { %240 = vmatpush.msra.mxu0 %v215_v18  ;;  %260 = vmatpush.msra.mxu1 %v216_v19  ;;  %v90_v52 = vpop.permute.xlu2 %89  ;;  %v1931_v18 = vld [vmem:[%s2879_s1 + $0x40] sm:$0xff]  ;;  %v1936_v19 = vld [vmem:[%s2879_s1 + $0x48] sm:$0xff] }
  0x9e   :  { %302 = vmatpush.msra.mxu3 %v210_v14 }
  0x9f   :  { %v129_v28 = vpop.permute.xlu0 %128  ;;  %v131_v30 = vpop.permute.xlu1 %130  ;;  %241 = vmatpush.msra.mxu0 %v211_v21  ;;  %261 = vmatpush.msra.mxu1 %v212_v6 }
  0xa0   :  { %v136_v2 = vsel %vm134_vm5, %v129_v28, %v131_v30  ;;  %v135_v7 = vsel %vm134_vm5, %v131_v30, %v133_v20 }
  0xa1   :  { %v205_v31 = vmul.f32 %v136_v2, %v1860_v26  ;;  %v206_v32 = vmul.f32 %v135_v7, %v1865_v27  ;;  %242 = vmatpush.msra.mxu0 %v207_v24  ;;  %262 = vmatpush.msra.mxu1 %v208_v25 }
  0xa3   :  { %283 = vmatpush.msra.mxu2 %v205_v31  ;;  %303 = vmatpush.msra.mxu3 %v206_v32  ;;  %v1957_v32 = vld [vmem:[%s2879_s1 + $0x18] sm:$0xff] }
  0xa5   :  { %v92_v14 = vpop.permute.xlu2 %91 }
  0xa6   :  { %v96_v30 = vsel %vm95_vm8, %v90_v52, %v92_v14 }
  0xa7   :  { %v116_v38 = vpop.permute.xlu0 %115  ;;  %v118_v39 = vpop.permute.xlu1 %117 }
  0xa8   :  { %v123_v41 = vsel %vm121_vm6, %v116_v38, %v118_v39  ;;  %v122_v42 = vsel %vm121_vm6, %v118_v39, %v120_v35  ;;  %v1968_v39 = vld [vmem:[%s2879_s1 + $0x28] sm:$0xff] }
  0xa9   :  { %v201_v43 = vmul.f32 %v123_v41, %v1877_v36  ;;  %v202_v44 = vmul.f32 %v122_v42, %v1882_v37 }
  0xab   :  { %284 = vmatpush.msra.mxu2 %v201_v43  ;;  %304 = vmatpush.msra.mxu3 %v202_v44 }
  0xaf   :  { %v103_v48 = vpop.permute.xlu0 %102  ;;  %v105_v49 = vpop.permute.xlu1 %104 }
  0xb0   :  { %v110_v50 = vsel %vm108_vm7, %v103_v48, %v105_v49 }
  0xb1   :  { %v197_v51 = vmul.f32 %v110_v50, %v1894_v47 }
  0xb3   :  { %285 = vmatpush.msra.mxu2 %v197_v51  ;;  %v1982_v51 = vld [vmem:[%s2879_s1] sm:$0xff] }
  0xb7   :  { %v127_v60 = vpop.permute.xlu0 %126  ;;  %v88_v61 = vpop.permute.xlu1 %87 }
  0xb8   :  { %v137_v62 = vsel %vm134_vm5, %v127_v60, %v129_v28  ;;  %v138_v63 = vsel %vm134_vm5, %v133_v20, %v127_v60  ;;  %v97_v3 = vsel %vm95_vm8, %v88_v61, %v90_v52  ;;  %v1941_v20 = vld [vmem:[%s2879_s1 + $0x38] sm:$0xff]  ;;  %v1987_v52 = vld [vmem:[%s2879_s1 + $0x8] sm:$0xff] }
  0xb9   :  { %v203_v4 = vmul.f32 %v138_v63, %v1903_v56  ;;  %v204_v5 = vmul.f32 %v137_v62, %v1908_v57  ;;  %v193_v8 = vmul.f32 %v97_v3, %v1913_v58 }
  0xbb   :  { %243 = vmatpush.msra.mxu0 %v203_v4  ;;  %263 = vmatpush.msra.mxu1 %v204_v5 }
  0xbc   :  { %286 = vmatpush.msra.mxu2 %v193_v8 }
  0xbd   :  { %1416 = vmatmul.msk.f32.vlgmr.msra.gmra.mxu2 %vm227_vm9, %v66_v10 }
  0xbf   :  { %v107_v6 = vpop.permute.xlu0 %106  ;;  %v114_v21 = vpop.permute.xlu1 %113 }
  0xc0   :  { %v109_v24 = vsel %vm108_vm7, %v105_v49, %v107_v6  ;;  %v124_v25 = vsel %vm121_vm6, %v114_v21, %v116_v38  ;;  %v125_v28 = vsel %vm121_vm6, %v120_v35, %v114_v21  ;;  %v194_v38 = vmul.f32 %v96_v30, %v1957_v32  ;;  %v1963_v35 = vld [vmem:[%s2879_s1 + $0x20] sm:$0xff] }
  0xc1   :  { %v199_v2 = vmul.f32 %v125_v28, %v1931_v18  ;;  %v200_v7 = vmul.f32 %v124_v25, %v1936_v19  ;;  %v198_v31 = vmul.f32 %v109_v24, %v1941_v20 }
  0xc3   :  { %244 = vmatpush.msra.mxu0 %v199_v2  ;;  %264 = vmatpush.msra.mxu1 %v200_v7 }
  0xc4   :  { %305 = vmatpush.msra.mxu3 %v198_v31  ;;  %v1558_v31 = vmov 0  }
  0xc5   :  { %1453 = vset.pattern.permute.xlu1 %v1558_v31 }
  0xc6   :  { %306 = vmatpush.msra.mxu3 %v194_v38 }
  0xc7   :  { %v101_v41 = vpop.permute.xlu0 %100  ;;  %v86_v42 = vpop.permute.xlu1 %85  ;;  %1417 = vmatmul.msk.f32.vlgmr.msra.gmra.mxu3 %vm227_vm9, %v66_v10 }
  0xc8   :  { %v111_v43 = vsel %vm108_vm7, %v101_v41, %v103_v48  ;;  %v112_v44 = vsel %vm108_vm7, %v107_v6, %v101_v41  ;;  %v98_v49 = vsel %vm95_vm8, %v86_v42, %v88_v61  ;;  %v99_v50 = vsel %vm95_vm8, %v92_v14, %v86_v42 }
  0xc9   :  { %v195_v48 = vmul.f32 %v112_v44, %v1963_v35  ;;  %v196_v60 = vmul.f32 %v111_v43, %v1968_v39  ;;  %v191_v61 = vmul.f32 %v99_v50, %v1982_v51  ;;  %v192_v62 = vmul.f32 %v98_v49, %v1987_v52 }
  0xcb   :  { %245 = vmatpush.msra.mxu0 %v195_v48  ;;  %265 = vmatpush.msra.mxu1 %v196_v60 }
  0xcd   :  { %246 = vmatpush.msra.mxu0 %v191_v61  ;;  %266 = vmatpush.msra.mxu1 %v192_v62 }
  0xce   :  { %1414 = vmatmul.msk.f32.vlgmr.msra.gmra.mxu0 %vm227_vm9, %v66_v10  ;;  %1415 = vmatmul.msk.f32.vlgmr.msra.gmra.mxu1 %vm227_vm9, %v66_v10 }
 0x140   :  { %v288_v63 = vpop.f32.mrf.mxu2 }
 0x141   :  { %v313_v21 = vmul.f32 %v288_v63, %v288_v63 }
 0x14a   :  { %v308_v3 = vpop.f32.mrf.mxu3 }
 0x14b   :  { %v248_v4 = vpop.f32.mrf.mxu0  ;;  %v268_v5 = vpop.f32.mrf.mxu1  ;;  %v314_v25 = vmul.f32 %v308_v3, %v308_v3 }
 0x14c   :  { %v311_v8 = vmul.f32 %v248_v4, %v248_v4  ;;  %v312_v14 = vmul.f32 %v268_v5, %v268_v5  ;;  %v315_v6 = vadd.f32 %v268_v5, %v248_v4 }
 0x14e   :  { %v316_v24 = vadd.f32 %v315_v6, %v288_v63  ;;  %v320_v28 = vadd.f32 %v312_v14, %v311_v8  ;;  %v1998_v14 = vld [vmem:[%s2881_s3] sm:$0xff] }
 0x150   :  { %v317_v30 = vadd.f32 %v316_v24, %v308_v3  ;;  %v321_v2 = vadd.f32 %v320_v28, %v313_v21  ;;  %v1559_v28 = vmov 1  }
 0x152   :  { %318 = vadd.xlane.f32.xlu2 %v317_v30  ;;  %v322_v7 = vadd.f32 %v321_v2, %v314_v25 }
 0x154   :  { %323 = vadd.xlane.f32.xlu0 %v322_v7 }
 0x1c5   :  { %v319_v38 = vpop.xlane.xlu2 %318 }
 0x1c6   :  { %v325_v10 = vmul.f32 0.001953125, %v319_v38 }
 0x1c7   :  { %v324_v41 = vpop.xlane.xlu0 %323 }
 0x1c8   :  { %v327_v42 = vmul.f32 %v325_v10, %v325_v10  ;;  %v326_v43 = vmul.f32 0.001953125, %v324_v41 }
 0x1ca   :  { %v328_v44 = vsub.f32 %v326_v43, %v327_v42 }
 0x1cc   :  { %v329_v49 = vmax.f32 %v328_v44, 0.0 }
 0x1ce   :  { %v330_v50 = vadd.f32 1e-05, %v329_v49 }
 0x1d0   :  { %1461 = vrsqrt.f32 %v330_v50  ;;  %vm337_vm11 = vweird.f32 %v330_v50 }
 0x1d6   :  { %v1462_v48 = vpop.eup %1461 }
 0x1d7   :  { %v332_v60 = vmul.f32 %v1462_v48, %v330_v50  ;;  %vm338_vm10 = vweird.f32 %v1462_v48 }
 0x1d8   :  { %vm339_vm12 = vmor %vm337_vm11, %vm338_vm10 }
 0x1d9   :  { %v333_v61 = vmul.f32 %v1462_v48, %v332_v60 }
 0x1db   :  { %v334_v62 = vmul.f32 0.5, %v333_v61 }
 0x1dd   :  { %v335_v8 = vsub.f32 1.5, %v334_v62 }
 0x1df   :  { %v336_v6 = vmul.f32 %v1462_v48, %v335_v8 }
 0x1e1   :  { %v340_v21 = vsel %vm339_vm12, %v1462_v48, %v336_v6 }
 0x1e2   :  { %v341_v24 = vmul.f32 %v340_v21, %v1998_v14 }
 0x1e4   :  { %350 = vperm.xlu1 %1453, %v341_v24   ;;  %v342_v25 = vmul.f32 %v341_v24, %v325_v10 }
 0x1ec   :  { %344 = vrot.lane.b32.xlu1 %v342_v25, %s1554_s12 }
 0x1ed   :  { %1454 = vset.pattern.permute.xlu1 %v1559_v28 }
 0x256   :  { %v351_v30 = vpop.permute.xlu1 %350 }
 0x257   :  { %v353_v31 = vmul.f32 %v351_v30, %v248_v4  ;;  %v355_v38 = vmul.f32 %v351_v30, %v288_v63  ;;  %v356_v50 = vmul.f32 %v351_v30, %v308_v3  ;;  %v354_v10 = vmul.f32 %v351_v30, %v268_v5 }
 0x25e   :  { %v345_v2 = vpop.permute.xlu1 %344 }
 0x25f   :  { %v347_v7 = vsub.f32 %v1998_v14, %v345_v2 }
 0x261   :  { %359 = vperm.xlu1 %1454, %v347_v7  }
 0x2d3   :  { %v360_v41 = vpop.permute.xlu1 %359 }
 0x2d4   :  { %v362_v42 = vadd.f32 %v360_v41, %v353_v31  ;;  %v364_v43 = vadd.f32 %v360_v41, %v355_v38  ;;  %v365_v4 = vadd.f32 %v360_v41, %v356_v50  ;;  %v363_v63 = vadd.f32 %v360_v41, %v354_v10 }
 0x2d6   :  { %v2003_v44 = vmax.f32 %v362_v42, 0.0  ;;  %v2005_v49 = vmax.f32 %v364_v43, 0.0  ;;  %v2013_v48 = vmax.f32 %v365_v4, 0.0  ;;  %v2015_v60 = vmax.f32 %v363_v63, 0.0 }
 0x2d8   :  { %446 = vrot.lane.b32.xlu2 %v2005_v49, %s1551_s10  ;;  %458 = vrot.lane.b32.xlu1 %v2005_v49, %s1550_s9 }
 0x2d9   :  { %454 = vrot.lane.b32.xlu0 %v2003_v44, %s1550_s9 }
 0x2e0   :  { %460 = vrot.lane.b32.xlu1 %v2013_v48, %s1550_s9  ;;  %442 = vrot.lane.b32.xlu2 %v2003_v44, %s1551_s10 }
 0x2e1   :  { %456 = vrot.lane.b32.xlu0 %v2015_v60, %s1550_s9 }
 0x2e8   :  { %448 = vrot.lane.b32.xlu1 %v2013_v48, %s1551_s10  ;;  %424 = vrot.lane.b32.xlu2 %v2013_v48, %s1553_s11 }
 0x2e9   :  { %430 = vrot.lane.b32.xlu0 %v2003_v44, %s1552_s0 }
 0x2f0   :  { %434 = vrot.lane.b32.xlu1 %v2005_v49, %s1552_s0  ;;  %418 = vrot.lane.b32.xlu2 %v2003_v44, %s1553_s11 }
 0x2f1   :  { %432 = vrot.lane.b32.xlu0 %v2015_v60, %s1552_s0 }
 0x2f8   :  { %436 = vrot.lane.b32.xlu1 %v2013_v48, %s1552_s0  ;;  %410 = vrot.lane.b32.xlu2 %v2005_v49, %s1554_s12 }
 0x2f9   :  { %420 = vrot.lane.b32.xlu0 %v2015_v60, %s1553_s11 }
 0x300   :  { %422 = vrot.lane.b32.xlu1 %v2005_v49, %s1553_s11  ;;  %398 = vrot.lane.b32.xlu2 %v2005_v49, %s1555_s13 }
 0x301   :  { %412 = vrot.lane.b32.xlu0 %v2013_v48, %s1554_s12 }
 0x308   :  { %444 = vrot.lane.b32.xlu1 %v2015_v60, %s1551_s10  ;;  %386 = vrot.lane.b32.xlu2 %v2005_v49, %s1556_s14 }
 0x309   :  { %400 = vrot.lane.b32.xlu0 %v2013_v48, %s1555_s13 }
 0x310   :  { %408 = vrot.lane.b32.xlu1 %v2015_v60, %s1554_s12  ;;  %372 = vrot.lane.b32.xlu2 %v2015_v60, %s1557_s15 }
 0x311   :  { %374 = vrot.lane.b32.xlu0 %v2005_v49, %s1557_s15 }
 0x318   :  { %396 = vrot.lane.b32.xlu1 %v2015_v60, %s1555_s13  ;;  %394 = vrot.lane.b32.xlu2 %v2003_v44, %s1555_s13 }
 0x319   :  { %376 = vrot.lane.b32.xlu0 %v2013_v48, %s1557_s15 }
 0x320   :  { %384 = vrot.lane.b32.xlu1 %v2015_v60, %s1556_s14  ;;  %370 = vrot.lane.b32.xlu2 %v2003_v44, %s1557_s15 }
 0x328   :  { %406 = vrot.lane.b32.xlu1 %v2003_v44, %s1554_s12 }
 0x330   :  { %388 = vrot.lane.b32.xlu1 %v2013_v48, %s1556_s14 }
 0x332   :  { %v447_v3 = vpop.permute.xlu2 %446 }
 0x338   :  { %382 = vrot.lane.b32.xlu1 %v2003_v44, %s1556_s14 }
 0x33a   :  { %v443_v8 = vpop.permute.xlu2 %442 }
 0x342   :  { %v425_v4 = vpop.permute.xlu2 %424 }
 0x34a   :  { %v459_v5 = vpop.permute.xlu1 %458  ;;  %v419_v63 = vpop.permute.xlu2 %418 }
 0x34b   :  { %v455_v61 = vpop.permute.xlu0 %454 }
 0x352   :  { %v461_v62 = vpop.permute.xlu1 %460 }
 0x353   :  { %v462_v6 = vsel %vm186_vm1, %v459_v5, %v461_v62  ;;  %v465_v21 = vsel %vm186_vm1, %v461_v62, %v455_v61  ;;  %v457_v24 = vpop.permute.xlu0 %456 }
 0x354   :  { %v463_v25 = vsel %vm186_vm1, %v457_v24, %v459_v5  ;;  %v464_v28 = vsel %vm186_vm1, %v455_v61, %v457_v24  ;;  %v500_v30 = vmul.f32 %v462_v6, %v1717_v22  ;;  %v501_v2 = vmul.f32 %v465_v21, %v1722_v23 }
 0x355   :  { %v498_v7 = vmul.f32 %v464_v28, %v1699_v12  ;;  %v499_v31 = vmul.f32 %v463_v25, %v1708_v16  ;;  %v429_v61 = vsel %vm147_vm4, %v425_v4, %v419_v63 }
 0x356   :  { %552 = vmatpush.msrb.mxu2 %v500_v30  ;;  %572 = vmatpush.msrb.mxu3 %v501_v2  ;;  %v489_v28 = vmul.f32 %v429_v61, %v1792_v55  ;;  %v485_v30 = vmul.f32 %v2013_v48, %v1799_v59  ;;  %v411_v2 = vpop.permute.xlu2 %410 }
 0x357   :  { %512 = vmatpush.msrb.mxu0 %v498_v7  ;;  %532 = vmatpush.msrb.mxu1 %v499_v31 }
 0x35a   :  { %v449_v38 = vpop.permute.xlu1 %448 }
 0x35b   :  { %v450_v41 = vsel %vm173_vm2, %v447_v3, %v449_v38  ;;  %v453_v42 = vsel %vm173_vm2, %v449_v38, %v443_v8  ;;  %v431_v43 = vpop.permute.xlu0 %430 }
 0x35c   :  { %v496_v50 = vmul.f32 %v450_v41, %v1733_v29  ;;  %v497_v10 = vmul.f32 %v453_v42, %v1747_v34 }
 0x35e   :  { %553 = vmatpush.msrb.mxu2 %v496_v50  ;;  %573 = vmatpush.msrb.mxu3 %v497_v10  ;;  %v484_v50 = vmul.f32 %v2005_v49, %v1772_v46  ;;  %v399_v10 = vpop.permute.xlu2 %398 }
 0x362   :  { %v435_v12 = vpop.permute.xlu1 %434 }
 0x363   :  { %v433_v16 = vpop.permute.xlu0 %432 }
 0x36a   :  { %v437_v5 = vpop.permute.xlu1 %436 }
 0x36b   :  { %v438_v62 = vsel %vm160_vm3, %v435_v12, %v437_v5  ;;  %v441_v6 = vsel %vm160_vm3, %v437_v5, %v431_v43  ;;  %v421_v21 = vpop.permute.xlu0 %420  ;;  %v439_v5 = vsel %vm160_vm3, %v433_v16, %v435_v12 }
 0x36c   :  { %v492_v24 = vmul.f32 %v438_v62, %v1742_v33  ;;  %v493_v25 = vmul.f32 %v441_v6, %v1758_v40  ;;  %v428_v12 = vsel %vm147_vm4, %v419_v63, %v421_v21  ;;  %v482_v63 = vmul.f32 %v2003_v44, %v1841_v15 }
 0x36e   :  { %554 = vmatpush.msrb.mxu2 %v492_v24  ;;  %574 = vmatpush.msrb.mxu3 %v493_v25 }
 0x370   :  { %575 = vmatpush.msrb.mxu3 %v489_v28  ;;  %v486_v28 = vmul.f32 %v428_v12, %v1834_v13 }
 0x372   :  { %v423_v7 = vpop.permute.xlu1 %422  ;;  %576 = vmatpush.msrb.mxu3 %v485_v30 }
 0x373   :  { %v426_v31 = vsel %vm147_vm4, %v423_v7, %v425_v4  ;;  %v413_v38 = vpop.permute.xlu0 %412  ;;  %v440_v4 = vsel %vm160_vm3, %v431_v43, %v433_v16  ;;  %v427_v43 = vsel %vm147_vm4, %v421_v21, %v423_v7  ;;  %v483_v21 = vmul.f32 %v2015_v60, %v1846_v17 }
 0x374   :  { %v414_v41 = vsel %vm134_vm5, %v411_v2, %v413_v38  ;;  %v488_v40 = vmul.f32 %v426_v31, %v1767_v45  ;;  %v487_v30 = vmul.f32 %v427_v43, %v1827_v9 }
 0x375   :  { %v481_v42 = vmul.f32 %v414_v41, %v1865_v27 }
 0x376   :  { %555 = vmatpush.msrb.mxu2 %v488_v40  ;;  %v387_v40 = vpop.permute.xlu2 %386 }
 0x377   :  { %577 = vmatpush.msrb.mxu3 %v481_v42 }
 0x378   :  { %556 = vmatpush.msrb.mxu2 %v484_v50 }
 0x37a   :  { %v445_v48 = vpop.permute.xlu1 %444 }
 0x37b   :  { %v451_v61 = vsel %vm173_vm2, %v445_v48, %v447_v3  ;;  %v452_v62 = vsel %vm173_vm2, %v443_v8, %v445_v48  ;;  %v401_v6 = vpop.permute.xlu0 %400  ;;  %v490_v3 = vmul.f32 %v440_v4, %v1812_v0  ;;  %v491_v8 = vmul.f32 %v439_v5, %v1817_v1 }
 0x37c   :  { %v402_v49 = vsel %vm121_vm6, %v399_v10, %v401_v6  ;;  %v494_v24 = vmul.f32 %v452_v62, %v1782_v53  ;;  %v495_v25 = vmul.f32 %v451_v61, %v1787_v54 }
 0x37d   :  { %v477_v16 = vmul.f32 %v402_v49, %v1882_v37 }
 0x37e   :  { %513 = vmatpush.msrb.mxu0 %v494_v24  ;;  %533 = vmatpush.msrb.mxu1 %v495_v25  ;;  %v373_v15 = vpop.permute.xlu2 %372 }
 0x37f   :  { %578 = vmatpush.msrb.mxu3 %v477_v16 }
 0x380   :  { %514 = vmatpush.msrb.mxu0 %v490_v3  ;;  %534 = vmatpush.msrb.mxu1 %v491_v8 }
 0x382   :  { %v409_v31 = vpop.permute.xlu1 %408  ;;  %515 = vmatpush.msrb.mxu0 %v486_v28  ;;  %535 = vmatpush.msrb.mxu1 %v487_v30 }
 0x383   :  { %v415_v7 = vsel %vm134_vm5, %v409_v31, %v411_v2  ;;  %v375_v44 = vpop.permute.xlu0 %374 }
 0x384   :  { %516 = vmatpush.msrb.mxu0 %v482_v63  ;;  %536 = vmatpush.msrb.mxu1 %v483_v21  ;;  %v480_v41 = vmul.f32 %v415_v7, %v1860_v26  ;;  %v379_v17 = vsel %vm95_vm8, %v373_v15, %v375_v44 }
 0x385   :  { %v468_v5 = vmul.f32 %v379_v17, %v1913_v58 }
 0x386   :  { %557 = vmatpush.msrb.mxu2 %v480_v41  ;;  %v395_v4 = vpop.permute.xlu2 %394 }
 0x387   :  { %v405_v62 = vsel %vm121_vm6, %v401_v6, %v395_v4 }
 0x388   :  { %v474_v16 = vmul.f32 %v405_v62, %v1931_v18 }
 0x38a   :  { %v397_v42 = vpop.permute.xlu1 %396 }
 0x38b   :  { %v403_v9 = vsel %vm121_vm6, %v397_v42, %v399_v10  ;;  %v67_v10 = vld [vmem:[%s2880_s2 + $0x8] sm:$0xff]  ;;  %v404_v49 = vsel %vm121_vm6, %v395_v4, %v397_v42  ;;  %v377_v6 = vpop.permute.xlu0 %376 }
 0x38c   :  { %v476_v50 = vmul.f32 %v403_v9, %v1877_v36  ;;  %v475_v3 = vmul.f32 %v404_v49, %v1936_v19  ;;  %v378_v28 = vsel %vm95_vm8, %v375_v44, %v377_v6 }
 0x38e   :  { %558 = vmatpush.msrb.mxu2 %v476_v50  ;;  %v371_v63 = vpop.permute.xlu2 %370 }
 0x38f   :  { %v380_v7 = vsel %vm95_vm8, %v371_v63, %v373_v15  ;;  %v381_v41 = vsel %vm95_vm8, %v377_v6, %v371_v63 }
 0x390   :  { %v466_v44 = vmul.f32 %v381_v41, %v1982_v51  ;;  %v467_v17 = vmul.f32 %v380_v7, %v1987_v52 }
 0x392   :  { %v385_v48 = vpop.permute.xlu1 %384 }
 0x393   :  { %v391_v60 = vsel %vm108_vm7, %v385_v48, %v387_v40 }
 0x394   :  { %v472_v2 = vmul.f32 %v391_v60, %v1894_v47 }
 0x396   :  { %559 = vmatpush.msrb.mxu2 %v472_v2 }
 0x398   :  { %560 = vmatpush.msrb.mxu2 %v468_v5 }
 0x399   :  { %1420 = vmatmul.msk.f32.vlgmr.msrb.gmra.mxu2 %vm227_vm9, %v67_v10 }
 0x39a   :  { %v407_v61 = vpop.permute.xlu1 %406 }
 0x39b   :  { %v416_v24 = vsel %vm134_vm5, %v407_v61, %v409_v31  ;;  %v417_v25 = vsel %vm134_vm5, %v413_v38, %v407_v61  ;;  %v469_v31 = vmul.f32 %v378_v28, %v1957_v32 }
 0x39c   :  { %v478_v12 = vmul.f32 %v417_v25, %v1903_v56  ;;  %v479_v43 = vmul.f32 %v416_v24, %v1908_v57 }
 0x39e   :  { %517 = vmatpush.msrb.mxu0 %v478_v12  ;;  %537 = vmatpush.msrb.mxu1 %v479_v43 }
 0x3a0   :  { %518 = vmatpush.msrb.mxu0 %v474_v16  ;;  %538 = vmatpush.msrb.mxu1 %v475_v3  ;;  %v1560_v3 = vmov 2  }
 0x3a1   :  { %1455 = vset.pattern.permute.xlu2 %v1560_v3 }
 0x3a2   :  { %v389_v8 = vpop.permute.xlu1 %388 }
 0x3a3   :  { %v390_v38 = vsel %vm108_vm7, %v387_v40, %v389_v8 }
 0x3a4   :  { %v473_v30 = vmul.f32 %v390_v38, %v1941_v20 }
 0x3a6   :  { %579 = vmatpush.msrb.mxu3 %v473_v30 }
 0x3a8   :  { %580 = vmatpush.msrb.mxu3 %v469_v31 }
 0x3a9   :  { %1421 = vmatmul.msk.f32.vlgmr.msrb.gmra.mxu3 %vm227_vm9, %v67_v10 }
 0x3aa   :  { %v383_v21 = vpop.permute.xlu1 %382 }
 0x3ab   :  { %v392_v42 = vsel %vm108_vm7, %v383_v21, %v385_v48  ;;  %v393_v40 = vsel %vm108_vm7, %v389_v8, %v383_v21 }
 0x3ac   :  { %v470_v9 = vmul.f32 %v393_v40, %v1963_v35  ;;  %v471_v50 = vmul.f32 %v392_v42, %v1968_v39 }
 0x3ae   :  { %519 = vmatpush.msrb.mxu0 %v470_v9  ;;  %539 = vmatpush.msrb.mxu1 %v471_v50 }
 0x3b0   :  { %520 = vmatpush.msrb.mxu0 %v466_v44  ;;  %540 = vmatpush.msrb.mxu1 %v467_v17 }
 0x3b1   :  { %1418 = vmatmul.msk.f32.vlgmr.msrb.gmra.mxu0 %vm227_vm9, %v67_v10  ;;  %1419 = vmatmul.msk.f32.vlgmr.msrb.gmra.mxu1 %vm227_vm9, %v67_v10 }
 0x41c   :  { %v562_v15 = vpop.f32.mrf.mxu2 }
 0x41d   :  { %v587_v62 = vmul.f32 %v562_v15, %v562_v15 }
 0x42c   :  { %v582_v48 = vpop.f32.mrf.mxu3 }
 0x42d   :  { %v588_v24 = vmul.f32 %v582_v48, %v582_v48 }
 0x42e   :  { %v522_v60 = vpop.f32.mrf.mxu0  ;;  %v542_v2 = vpop.f32.mrf.mxu1 }
 0x42f   :  { %v585_v5 = vmul.f32 %v522_v60, %v522_v60  ;;  %v586_v4 = vmul.f32 %v542_v2, %v542_v2  ;;  %v589_v61 = vadd.f32 %v542_v2, %v522_v60 }
 0x431   :  { %v590_v49 = vadd.f32 %v589_v61, %v562_v15  ;;  %v594_v25 = vadd.f32 %v586_v4, %v585_v5  ;;  %v1561_v5 = vmov 3  }
 0x433   :  { %v591_v12 = vadd.f32 %v590_v49, %v582_v48  ;;  %v595_v43 = vadd.f32 %v594_v25, %v587_v62 }
 0x435   :  { %592 = vadd.xlane.f32.xlu0 %v591_v12  ;;  %v596_v16 = vadd.f32 %v595_v43, %v588_v24 }
 0x437   :  { %597 = vadd.xlane.f32.xlu1 %v596_v16 }
 0x4a8   :  { %v593_v6 = vpop.xlane.xlu0 %592 }
 0x4a9   :  { %v599_v10 = vmul.f32 0.001953125, %v593_v6 }
 0x4aa   :  { %v598_v8 = vpop.xlane.xlu1 %597 }
 0x4ab   :  { %v601_v28 = vmul.f32 %v599_v10, %v599_v10  ;;  %v600_v38 = vmul.f32 0.001953125, %v598_v8 }
 0x4ad   :  { %v602_v30 = vsub.f32 %v600_v38, %v601_v28 }
 0x4af   :  { %v603_v31 = vmax.f32 %v602_v30, 0.0 }
 0x4b1   :  { %v604_v63 = vadd.f32 1e-05, %v603_v31 }
 0x4b3   :  { %1463 = vrsqrt.f32 %v604_v63  ;;  %vm611_vm14 = vweird.f32 %v604_v63 }
 0x4b9   :  { %v1464_v21 = vpop.eup %1463 }
 0x4ba   :  { %v606_v7 = vmul.f32 %v1464_v21, %v604_v63  ;;  %vm612_vm13 = vweird.f32 %v1464_v21 }
 0x4bb   :  { %vm613_vm15 = vmor %vm611_vm14, %vm612_vm13 }
 0x4bc   :  { %v607_v41 = vmul.f32 %v1464_v21, %v606_v7 }
 0x4be   :  { %v608_v42 = vmul.f32 0.5, %v607_v41 }
 0x4c0   :  { %v609_v40 = vsub.f32 1.5, %v608_v42 }
 0x4c2   :  { %v610_v9 = vmul.f32 %v1464_v21, %v609_v40 }
 0x4c4   :  { %v614_v50 = vsel %vm613_vm15, %v1464_v21, %v610_v9  ;;  %vm1220_vm15 = vcmask 1043456  }
 0x4c5   :  { %v615_v44 = vmul.f32 %v614_v50, %v1998_v14 }
 0x4c7   :  { %624 = vperm.xlu2 %1455, %v615_v44   ;;  %v616_v17 = vmul.f32 %v615_v44, %v599_v10 }
 0x4cf   :  { %618 = vrot.lane.b32.xlu2 %v616_v17, %s1554_s12 }
 0x4d0   :  { %1456 = vset.pattern.permute.xlu2 %v1561_v5 }
 0x521   :  { %v625_v4 = vpop.permute.xlu2 %624 }
 0x522   :  { %v627_v49 = vmul.f32 %v625_v4, %v522_v60  ;;  %v629_v24 = vmul.f32 %v625_v4, %v562_v15  ;;  %v630_v6 = vmul.f32 %v625_v4, %v582_v48  ;;  %v628_v15 = vmul.f32 %v625_v4, %v542_v2 }
 0x529   :  { %v619_v61 = vpop.permute.xlu2 %618 }
 0x52a   :  { %v621_v62 = vsub.f32 %v1998_v14, %v619_v61 }
 0x52c   :  { %633 = vperm.xlu2 %1456, %v621_v62  }
 0x586   :  { %v634_v25 = vpop.permute.xlu2 %633 }
 0x587   :  { %v636_v12 = vadd.f32 %v634_v25, %v627_v49  ;;  %v638_v43 = vadd.f32 %v634_v25, %v629_v24  ;;  %v639_v10 = vadd.f32 %v634_v25, %v630_v6  ;;  %v637_v48 = vadd.f32 %v634_v25, %v628_v15 }
 0x589   :  { %v2189_v16 = vmax.f32 %v636_v12, 0.0  ;;  %v2191_v3 = vmax.f32 %v638_v43, 0.0  ;;  %v2199_v60 = vmax.f32 %v639_v10, 0.0  ;;  %v2207_v8 = vmax.f32 %v637_v48, 0.0  ;;  %v2291_v12 = vld [vmem:[%s2879_s1 + $0x108] sm:$0xff] }
 0x58b   :  { %720 = vrot.lane.b32.xlu0 %v2191_v3, %s1551_s10  ;;  %732 = vrot.lane.b32.xlu2 %v2191_v3, %s1550_s9 }
 0x58c   :  { %728 = vrot.lane.b32.xlu1 %v2189_v16, %s1550_s9 }
 0x593   :  { %734 = vrot.lane.b32.xlu2 %v2199_v60, %s1550_s9  ;;  %716 = vrot.lane.b32.xlu0 %v2189_v16, %s1551_s10 }
 0x594   :  { %696 = vrot.lane.b32.xlu1 %v2191_v3, %s1553_s11 }
 0x59b   :  { %722 = vrot.lane.b32.xlu2 %v2199_v60, %s1551_s10  ;;  %698 = vrot.lane.b32.xlu0 %v2199_v60, %s1553_s11 }
 0x59c   :  { %718 = vrot.lane.b32.xlu1 %v2207_v8, %s1551_s10 }
 0x5a3   :  { %708 = vrot.lane.b32.xlu2 %v2191_v3, %s1552_s0  ;;  %692 = vrot.lane.b32.xlu0 %v2189_v16, %s1553_s11 }
 0x5a4   :  { %682 = vrot.lane.b32.xlu1 %v2207_v8, %s1554_s12 }
 0x5ab   :  { %710 = vrot.lane.b32.xlu2 %v2199_v60, %s1552_s0  ;;  %684 = vrot.lane.b32.xlu0 %v2191_v3, %s1554_s12 }
 0x5ac   :  { %670 = vrot.lane.b32.xlu1 %v2207_v8, %s1555_s13 }
 0x5b3   :  { %730 = vrot.lane.b32.xlu2 %v2207_v8, %s1550_s9  ;;  %672 = vrot.lane.b32.xlu0 %v2191_v3, %s1555_s13 }
 0x5b4   :  { %658 = vrot.lane.b32.xlu1 %v2207_v8, %s1556_s14 }
 0x5bb   :  { %704 = vrot.lane.b32.xlu2 %v2189_v16, %s1552_s0  ;;  %660 = vrot.lane.b32.xlu0 %v2191_v3, %s1556_s14 }
 0x5bc   :  { %680 = vrot.lane.b32.xlu1 %v2189_v16, %s1554_s12 }
 0x5c3   :  { %706 = vrot.lane.b32.xlu2 %v2207_v8, %s1552_s0  ;;  %646 = vrot.lane.b32.xlu0 %v2207_v8, %s1557_s15 }
 0x5c4   :  { %662 = vrot.lane.b32.xlu1 %v2199_v60, %s1556_s14 }
 0x5cb   :  { %694 = vrot.lane.b32.xlu2 %v2207_v8, %s1553_s11  ;;  %668 = vrot.lane.b32.xlu0 %v2189_v16, %s1555_s13 }
 0x5cc   :  { %656 = vrot.lane.b32.xlu1 %v2189_v16, %s1556_s14 }
 0x5d3   :  { %686 = vrot.lane.b32.xlu2 %v2199_v60, %s1554_s12  ;;  %644 = vrot.lane.b32.xlu0 %v2189_v16, %s1557_s15 }
 0x5db   :  { %674 = vrot.lane.b32.xlu2 %v2199_v60, %s1555_s13 }
 0x5e3   :  { %648 = vrot.lane.b32.xlu2 %v2191_v3, %s1557_s15 }
 0x5e5   :  { %v733_v2 = vpop.permute.xlu2 %732 }
 0x5eb   :  { %650 = vrot.lane.b32.xlu2 %v2199_v60, %s1557_s15 }
 0x5ed   :  { %v735_v28 = vpop.permute.xlu2 %734 }
 0x5ee   :  { %v736_v38 = vsel %vm186_vm1, %v733_v2, %v735_v28 }
 0x5ef   :  { %v774_v30 = vmul.f32 %v736_v38, %v1717_v22 }
 0x5f1   :  { %826 = vmatpush.msra.mxu2 %v774_v30 }
 0x5f5   :  { %v723_v31 = vpop.permute.xlu2 %722 }
 0x5fd   :  { %v721_v63 = vpop.permute.xlu0 %720  ;;  %v709_v21 = vpop.permute.xlu2 %708 }
 0x5fe   :  { %v724_v7 = vsel %vm173_vm2, %v721_v63, %v723_v31  ;;  %v729_v41 = vpop.permute.xlu1 %728 }
 0x5ff   :  { %v770_v42 = vmul.f32 %v724_v7, %v1733_v29  ;;  %v739_v40 = vsel %vm186_vm1, %v735_v28, %v729_v41  ;;  %v758_v28 = vmul.f32 %v2191_v3, %v1772_v46  ;;  %v759_v3 = vmul.f32 %v2199_v60, %v1799_v59 }
 0x600   :  { %v775_v9 = vmul.f32 %v739_v40, %v1722_v23 }
 0x601   :  { %827 = vmatpush.msra.mxu2 %v770_v42 }
 0x602   :  { %846 = vmatpush.msra.mxu3 %v775_v9 }
 0x605   :  { %v711_v50 = vpop.permute.xlu2 %710  ;;  %v717_v44 = vpop.permute.xlu0 %716 }
 0x606   :  { %v712_v22 = vsel %vm160_vm3, %v709_v21, %v711_v50  ;;  %v727_v17 = vsel %vm173_vm2, %v723_v31, %v717_v44  ;;  %v697_v5 = vpop.permute.xlu1 %696 }
 0x607   :  { %v766_v4 = vmul.f32 %v712_v22, %v1742_v33  ;;  %v771_v29 = vmul.f32 %v727_v17, %v1747_v34  ;;  %v2285_v33 = vld [vmem:[%s2879_s1 + $0x100] sm:$0xff] }
 0x609   :  { %828 = vmatpush.msra.mxu2 %v766_v4  ;;  %847 = vmatpush.msra.mxu3 %v771_v29 }
 0x60d   :  { %v731_v61 = vpop.permute.xlu2 %730  ;;  %v699_v62 = vpop.permute.xlu0 %698 }
 0x60e   :  { %v737_v23 = vsel %vm186_vm1, %v731_v61, %v733_v2  ;;  %v738_v49 = vsel %vm186_vm1, %v729_v41, %v731_v61  ;;  %v700_v24 = vsel %vm147_vm4, %v697_v5, %v699_v62  ;;  %v719_v25 = vpop.permute.xlu1 %718 }
 0x60f   :  { %v772_v34 = vmul.f32 %v2285_v33, %v738_v49  ;;  %v773_v43 = vmul.f32 %v2291_v12, %v737_v23  ;;  %v762_v6 = vmul.f32 %v700_v24, %v1767_v45  ;;  %v725_v10 = vsel %vm173_vm2, %v719_v25, %v721_v63 }
 0x610   :  { %v726_v15 = vsel %vm173_vm2, %v717_v44, %v719_v25  ;;  %v769_v2 = vmul.f32 %v725_v10, %v1787_v54  ;;  %v2310_v54 = vld [vmem:[%s2879_s1 + $0xd8] sm:$0xff] }
 0x611   :  { %v768_v48 = vmul.f32 %v726_v15, %v1782_v53  ;;  %786 = vmatpush.msra.mxu0 %v772_v34  ;;  %806 = vmatpush.msra.mxu1 %v773_v43 }
 0x612   :  { %829 = vmatpush.msra.mxu2 %v762_v6 }
 0x613   :  { %787 = vmatpush.msra.mxu0 %v768_v48  ;;  %807 = vmatpush.msra.mxu1 %v769_v2 }
 0x614   :  { %830 = vmatpush.msra.mxu2 %v758_v28 }
 0x615   :  { %v705_v45 = vpop.permute.xlu2 %704  ;;  %v693_v38 = vpop.permute.xlu0 %692 }
 0x616   :  { %v715_v30 = vsel %vm160_vm3, %v711_v50, %v705_v45  ;;  %v703_v31 = vsel %vm147_vm4, %v699_v62, %v693_v38  ;;  %v683_v53 = vpop.permute.xlu1 %682 }
 0x617   :  { %v767_v63 = vmul.f32 %v2310_v54, %v715_v30  ;;  %v763_v46 = vmul.f32 %v703_v31, %v1792_v55 }
 0x619   :  { %848 = vmatpush.msra.mxu3 %v767_v63 }
 0x61b   :  { %849 = vmatpush.msra.mxu3 %v763_v46 }
 0x61d   :  { %v707_v7 = vpop.permute.xlu2 %706  ;;  %v685_v41 = vpop.permute.xlu0 %684  ;;  %850 = vmatpush.msra.mxu3 %v759_v3 }
 0x61e   :  { %v713_v42 = vsel %vm160_vm3, %v707_v7, %v709_v21  ;;  %v714_v40 = vsel %vm160_vm3, %v705_v45, %v707_v7  ;;  %v689_v9 = vsel %vm134_vm5, %v683_v53, %v685_v41  ;;  %v671_v50 = vpop.permute.xlu1 %670 }
 0x61f   :  { %v764_v55 = vmul.f32 %v714_v40, %v1812_v0  ;;  %v765_v44 = vmul.f32 %v713_v42, %v1817_v1  ;;  %v754_v22 = vmul.f32 %v689_v9, %v1860_v26  ;;  %v2335_v1 = vld [vmem:[%s2879_s1 + $0xa8] sm:$0xff] }
 0x621   :  { %788 = vmatpush.msra.mxu0 %v764_v55  ;;  %808 = vmatpush.msra.mxu1 %v765_v44 }
 0x622   :  { %831 = vmatpush.msra.mxu2 %v754_v22 }
 0x625   :  { %v695_v59 = vpop.permute.xlu2 %694  ;;  %v673_v60 = vpop.permute.xlu0 %672 }
 0x626   :  { %v701_v21 = vsel %vm147_vm4, %v695_v59, %v697_v5  ;;  %v702_v17 = vsel %vm147_vm4, %v693_v38, %v695_v59  ;;  %v677_v4 = vsel %vm121_vm6, %v671_v50, %v673_v60  ;;  %v659_v29 = vpop.permute.xlu1 %658  ;;  %v2342_v5 = vld [vmem:[%s2879_s1 + $0x80] sm:$0xff] }
 0x627   :  { %v760_v0 = vmul.f32 %v702_v17, %v1834_v13  ;;  %v761_v26 = vmul.f32 %v2335_v1, %v701_v21  ;;  %v750_v61 = vmul.f32 %v677_v4, %v1877_v36  ;;  %v756_v62 = vmul.f32 %v2342_v5, %v2189_v16  ;;  %v2349_v13 = vld [vmem:[%s2879_s1 + $0x88] sm:$0xff] }
 0x628   :  { %v757_v23 = vmul.f32 %v2349_v13, %v2207_v8 }
 0x629   :  { %789 = vmatpush.msra.mxu0 %v760_v0  ;;  %809 = vmatpush.msra.mxu1 %v761_v26 }
 0x62a   :  { %832 = vmatpush.msra.mxu2 %v750_v61 }
 0x62b   :  { %790 = vmatpush.msra.mxu0 %v756_v62  ;;  %810 = vmatpush.msra.mxu1 %v757_v23  ;;  %v1562_v62 = vmov 4  }
 0x62c   :  { %1457 = vset.pattern.permute.xlu0 %v1562_v62 }
 0x62d   :  { %v687_v36 = vpop.permute.xlu2 %686  ;;  %v661_v49 = vpop.permute.xlu0 %660 }
 0x62e   :  { %v688_v24 = vsel %vm134_vm5, %v685_v41, %v687_v36  ;;  %v665_v25 = vsel %vm108_vm7, %v659_v29, %v661_v49  ;;  %v681_v16 = vpop.permute.xlu1 %680 }
 0x62f   :  { %v755_v34 = vmul.f32 %v688_v24, %v1865_v27  ;;  %v746_v43 = vmul.f32 %v665_v25, %v1894_v47  ;;  %v690_v6 = vsel %vm134_vm5, %v681_v16, %v683_v53  ;;  %v691_v8 = vsel %vm134_vm5, %v687_v36, %v681_v16 }
 0x630   :  { %v752_v10 = vmul.f32 %v691_v8, %v1903_v56  ;;  %v753_v15 = vmul.f32 %v690_v6, %v1908_v57 }
 0x631   :  { %833 = vmatpush.msra.mxu2 %v746_v43  ;;  %851 = vmatpush.msra.mxu3 %v755_v34 }
 0x632   :  { %791 = vmatpush.msra.mxu0 %v752_v10  ;;  %811 = vmatpush.msra.mxu1 %v753_v15 }
 0x635   :  { %v675_v48 = vpop.permute.xlu2 %674  ;;  %v647_v2 = vpop.permute.xlu0 %646 }
 0x636   :  { %v676_v27 = vsel %vm121_vm6, %v673_v60, %v675_v48  ;;  %v663_v47 = vpop.permute.xlu1 %662 }
 0x637   :  { %v751_v28 = vmul.f32 %v676_v27, %v1882_v37  ;;  %v664_v45 = vsel %vm108_vm7, %v661_v49, %v663_v47 }
 0x638   :  { %v747_v38 = vmul.f32 %v664_v45, %v1941_v20  ;;  %v1563_v45 = vmov 5  }
 0x639   :  { %852 = vmatpush.msra.mxu3 %v751_v28 }
 0x63b   :  { %853 = vmatpush.msra.mxu3 %v747_v38 }
 0x63d   :  { %v649_v56 = vpop.permute.xlu2 %648  ;;  %v669_v57 = vpop.permute.xlu0 %668 }
 0x63e   :  { %v653_v30 = vsel %vm95_vm8, %v647_v2, %v649_v56  ;;  %v678_v31 = vsel %vm121_vm6, %v669_v57, %v671_v50  ;;  %v679_v53 = vsel %vm121_vm6, %v675_v48, %v669_v57  ;;  %v657_v63 = vpop.permute.xlu1 %656 }
 0x63f   :  { %v742_v37 = vmul.f32 %v653_v30, %v1913_v58  ;;  %v748_v46 = vmul.f32 %v679_v53, %v1931_v18  ;;  %v749_v20 = vmul.f32 %v678_v31, %v1936_v19  ;;  %v666_v3 = vsel %vm108_vm7, %v657_v63, %v659_v29  ;;  %v68_v58 = vld [vmem:[%s2880_s2 + $0x10] sm:$0xff] }
 0x640   :  { %v667_v7 = vsel %vm108_vm7, %v663_v47, %v657_v63  ;;  %v745_v42 = vmul.f32 %v666_v3, %v1968_v39 }
 0x641   :  { %v744_v41 = vmul.f32 %v667_v7, %v1963_v35  ;;  %792 = vmatpush.msra.mxu0 %v748_v46  ;;  %812 = vmatpush.msra.mxu1 %v749_v20 }
 0x642   :  { %834 = vmatpush.msra.mxu2 %v742_v37 }
 0x643   :  { %793 = vmatpush.msra.mxu0 %v744_v41  ;;  %813 = vmatpush.msra.mxu1 %v745_v42 }
 0x644   :  { %1424 = vmatmul.msk.f32.vlgmr.msra.gmra.mxu2 %vm227_vm9, %v68_v58 }
 0x645   :  { %v651_v18 = vpop.permute.xlu2 %650  ;;  %v645_v19 = vpop.permute.xlu0 %644 }
 0x646   :  { %v652_v40 = vsel %vm95_vm8, %v649_v56, %v651_v18  ;;  %v654_v35 = vsel %vm95_vm8, %v645_v19, %v647_v2  ;;  %v655_v39 = vsel %vm95_vm8, %v651_v18, %v645_v19 }
 0x647   :  { %v743_v9 = vmul.f32 %v652_v40, %v1957_v32  ;;  %v740_v50 = vmul.f32 %v655_v39, %v1982_v51  ;;  %v741_v55 = vmul.f32 %v654_v35, %v1987_v52 }
 0x649   :  { %794 = vmatpush.msra.mxu0 %v740_v50  ;;  %814 = vmatpush.msra.mxu1 %v741_v55  ;;  %v1493_v55 = vld [vmem:[%s2879_s1 + $0x110] sm:$0xff] }
 0x64a   :  { %854 = vmatpush.msra.mxu3 %v743_v9  ;;  %1422 = vmatmul.msk.f32.vlgmr.msra.gmra.mxu0 %vm227_vm9, %v68_v58 }
 0x64b   :  { %1425 = vmatmul.msk.f32.vlgmr.msra.gmra.mxu3 %vm227_vm9, %v68_v58  ;;  %1423 = vmatmul.msk.f32.vlgmr.msra.gmra.mxu1 %vm227_vm9, %v68_v58 }
 0x6c7   :  { %v796_v44 = vpop.f32.mrf.mxu0  ;;  %v836_v22 = vpop.f32.mrf.mxu2 }
 0x6c8   :  { %v859_v59 = vmul.f32 %v796_v44, %v796_v44  ;;  %v816_v60 = vpop.f32.mrf.mxu1  ;;  %v861_v32 = vmul.f32 %v836_v22, %v836_v22 }
 0x6c9   :  { %v860_v21 = vmul.f32 %v816_v60, %v816_v60  ;;  %v863_v17 = vadd.f32 %v816_v60, %v796_v44 }
 0x6cb   :  { %v864_v4 = vadd.f32 %v863_v17, %v836_v22  ;;  %v868_v51 = vadd.f32 %v860_v21, %v859_v59  ;;  %v1494_v21 = vld [vmem:[%s2879_s1 + $0xf0] sm:$0xff] }
 0x6cd   :  { %v869_v29 = vadd.f32 %v868_v51, %v861_v32 }
 0x6ce   :  { %v856_v52 = vpop.f32.mrf.mxu3 }
 0x6cf   :  { %v865_v0 = vadd.f32 %v864_v4, %v856_v52  ;;  %v862_v26 = vmul.f32 %v856_v52, %v856_v52 }
 0x6d1   :  { %866 = vadd.xlane.f32.xlu2 %v865_v0  ;;  %v870_v61 = vadd.f32 %v869_v29, %v862_v26  ;;  %v1495_v0 = vld [vmem:[%s2879_s1 + $0x118] sm:$0xff] }
 0x6d3   :  { %871 = vadd.xlane.f32.xlu1 %v870_v61  ;;  %v1496_v61 = vld [vmem:[%s2879_s1 + $0xf8] sm:$0xff] }
 0x744   :  { %v867_v23 = vpop.xlane.xlu2 %866 }
 0x745   :  { %v873_v36 = vmul.f32 0.001953125, %v867_v23 }
 0x746   :  { %v872_v49 = vpop.xlane.xlu1 %871 }
 0x747   :  { %v875_v24 = vmul.f32 %v873_v36, %v873_v36  ;;  %v874_v25 = vmul.f32 0.001953125, %v872_v49 }
 0x749   :  { %v876_v16 = vsub.f32 %v874_v25, %v875_v24 }
 0x74b   :  { %v877_v34 = vmax.f32 %v876_v16, 0.0  ;;  %v1497_v16 = vld [vmem:[%s2879_s1 + $0xd0] sm:$0xff] }
 0x74d   :  { %v878_v43 = vadd.f32 1e-05, %v877_v34 }
 0x74f   :  { %1465 = vrsqrt.f32 %v878_v43  ;;  %vm885_vm10 = vweird.f32 %v878_v43 }
 0x755   :  { %v1466_v6 = vpop.eup %1465 }
 0x756   :  { %v880_v8 = vmul.f32 %v1466_v6, %v878_v43  ;;  %vm886_vm0 = vweird.f32 %v1466_v6 }
 0x757   :  { %vm887_vm11 = vmor %vm885_vm10, %vm886_vm0 }
 0x758   :  { %v881_v10 = vmul.f32 %v1466_v6, %v880_v8 }
 0x75a   :  { %v882_v15 = vmul.f32 0.5, %v881_v10 }
 0x75c   :  { %v883_v48 = vsub.f32 1.5, %v882_v15 }
 0x75e   :  { %v884_v2 = vmul.f32 %v1466_v6, %v883_v48 }
 0x760   :  { %v888_v27 = vsel %vm887_vm11, %v1466_v6, %v884_v2  ;;  %v1498_v2 = vld [vmem:[%s2879_s1 + $0xb0] sm:$0xff] }
 0x761   :  { %v889_v47 = vmul.f32 %v888_v27, %v1998_v14 }
 0x763   :  { %898 = vperm.xlu0 %1457, %v889_v47   ;;  %v890_v28 = vmul.f32 %v889_v47, %v873_v36  ;;  %v1499_v47 = vld [vmem:[%s2879_s1 + $0xb8] sm:$0xff] }
 0x76b   :  { %892 = vrot.lane.b32.xlu0 %v890_v28, %s1554_s12 }
 0x76c   :  { %1458 = vset.pattern.permute.xlu0 %v1563_v45  ;;  %v1500_v45 = vld [vmem:[%s2879_s1 + $0x90] sm:$0xff] }
 0x7d5   :  { %v899_v38 = vpop.permute.xlu0 %898 }
 0x7d6   :  { %v903_v30 = vmul.f32 %v899_v38, %v836_v22  ;;  %v904_v31 = vmul.f32 %v899_v38, %v856_v52  ;;  %v901_v3 = vmul.f32 %v899_v38, %v796_v44  ;;  %v902_v41 = vmul.f32 %v899_v38, %v816_v60 }
 0x7dd   :  { %v893_v56 = vpop.permute.xlu0 %892 }
 0x7de   :  { %v895_v57 = vsub.f32 %v1998_v14, %v893_v56 }
 0x7e0   :  { %907 = vperm.xlu0 %1458, %v895_v57   ;;  %v1501_v57 = vld [vmem:[%s2879_s1 + $0x98] sm:$0xff] }
 0x852   :  { %v908_v53 = vpop.permute.xlu0 %907 }
 0x853   :  { %v912_v63 = vadd.f32 %v908_v53, %v903_v30  ;;  %v913_v37 = vadd.f32 %v908_v53, %v904_v31  ;;  %v910_v14 = vadd.f32 %v908_v53, %v901_v3  ;;  %v911_v42 = vadd.f32 %v908_v53, %v902_v41  ;;  %v1502_v31 = vld [vmem:[%s2879_s1 + $0x70] sm:$0xff] }
 0x855   :  { %v2405_v46 = vmax.f32 %v912_v63, 0.0  ;;  %v2407_v20 = vmax.f32 %v913_v37, 0.0  ;;  %v2415_v7 = vmax.f32 %v910_v14, 0.0  ;;  %v2429_v58 = vmax.f32 %v911_v42, 0.0  ;;  %v1503_v63 = vld [vmem:[%s2879_s1 + $0x50] sm:$0xff] }
 0x857   :  { %1008 = vrot.lane.b32.xlu0 %v2407_v20, %s1550_s9  ;;  %994 = vrot.lane.b32.xlu1 %v2405_v46, %s1551_s10  ;;  %v1032_v38 = vmul.f32 %v1500_v45, %v2405_v46  ;;  %v1033_v30 = vmul.f32 %v1501_v57, %v2407_v20  ;;  %v1516_v57 = vld [vmem:[%s2879_s1 + $0x48] sm:$0xff] }
 0x858   :  { %1006 = vrot.lane.b32.xlu2 %v2405_v46, %s1550_s9 }
 0x85f   :  { %996 = vrot.lane.b32.xlu0 %v2407_v20, %s1551_s10  ;;  %990 = vrot.lane.b32.xlu1 %v2415_v7, %s1551_s10 }
 0x860   :  { %982 = vrot.lane.b32.xlu2 %v2405_v46, %s1552_s0 }
 0x867   :  { %978 = vrot.lane.b32.xlu1 %v2415_v7, %s1552_s0  ;;  %1002 = vrot.lane.b32.xlu0 %v2415_v7, %s1550_s9 }
 0x868   :  { %970 = vrot.lane.b32.xlu2 %v2405_v46, %s1553_s11 }
 0x86f   :  { %956 = vrot.lane.b32.xlu1 %v2429_v58, %s1554_s12  ;;  %984 = vrot.lane.b32.xlu0 %v2407_v20, %s1552_s0 }
 0x870   :  { %966 = vrot.lane.b32.xlu2 %v2415_v7, %s1553_s11 }
 0x877   :  { %944 = vrot.lane.b32.xlu1 %v2429_v58, %s1555_s13  ;;  %972 = vrot.lane.b32.xlu0 %v2407_v20, %s1553_s11 }
 0x878   :  { %958 = vrot.lane.b32.xlu2 %v2405_v46, %s1554_s12 }
 0x87f   :  { %980 = vrot.lane.b32.xlu1 %v2429_v58, %s1552_s0  ;;  %1004 = vrot.lane.b32.xlu0 %v2429_v58, %s1550_s9 }
 0x880   :  { %946 = vrot.lane.b32.xlu2 %v2405_v46, %s1555_s13 }
 0x887   :  { %948 = vrot.lane.b32.xlu1 %v2407_v20, %s1555_s13  ;;  %992 = vrot.lane.b32.xlu0 %v2429_v58, %s1551_s10 }
 0x888   :  { %932 = vrot.lane.b32.xlu2 %v2429_v58, %s1556_s14 }
 0x88f   :  { %922 = vrot.lane.b32.xlu1 %v2405_v46, %s1557_s15  ;;  %960 = vrot.lane.b32.xlu0 %v2407_v20, %s1554_s12 }
 0x890   :  { %968 = vrot.lane.b32.xlu2 %v2429_v58, %s1553_s11 }
 0x897   :  { %954 = vrot.lane.b32.xlu1 %v2415_v7, %s1554_s12  ;;  %934 = vrot.lane.b32.xlu0 %v2405_v46, %s1556_s14 }
 0x898   :  { %936 = vrot.lane.b32.xlu2 %v2407_v20, %s1556_s14 }
 0x89f   :  { %918 = vrot.lane.b32.xlu1 %v2415_v7, %s1557_s15  ;;  %920 = vrot.lane.b32.xlu0 %v2429_v58, %s1557_s15 }
 0x8a0   :  { %942 = vrot.lane.b32.xlu2 %v2415_v7, %s1555_s13 }
 0x8a7   :  { %924 = vrot.lane.b32.xlu0 %v2407_v20, %s1557_s15 }
 0x8af   :  { %930 = vrot.lane.b32.xlu0 %v2415_v7, %s1556_s14 }
 0x8b2   :  { %v2477_v18 = vpop.permute.xlu2 %1006 }
 0x8ba   :  { %v2479_v19 = vpop.permute.xlu2 %982 }
 0x8c2   :  { %v2481_v40 = vpop.permute.xlu2 %970 }
 0x8c9   :  { %v1009_v35 = vpop.permute.xlu0 %1008  ;;  %v2483_v39 = vpop.permute.xlu1 %994 }
 0x8ca   :  { %v1010_v9 = vsel %vm186_vm1, %v2477_v18, %v1009_v35  ;;  %v2488_v50 = vpop.permute.xlu2 %966 }
 0x8cb   :  { %v1048_v44 = vmul.f32 %v1493_v55, %v1010_v9 }
 0x8cd   :  { %1105 = vmatpush.msrb.mxu2 %v1048_v44 }
 0x8d1   :  { %v997_v22 = vpop.permute.xlu0 %996  ;;  %v2493_v59 = vpop.permute.xlu1 %990 }
 0x8d2   :  { %v998_v60 = vsel %vm173_vm2, %v2483_v39, %v997_v22  ;;  %v2501_v32 = vpop.permute.xlu2 %958  ;;  %v1001_v29 = vsel %vm173_vm2, %v997_v22, %v2493_v59 }
 0x8d3   :  { %v1044_v17 = vmul.f32 %v1494_v21, %v998_v60  ;;  %v1045_v62 = vmul.f32 %v1496_v61, %v1001_v29 }
 0x8d5   :  { %1106 = vmatpush.msrb.mxu2 %v1044_v17 }
 0x8d9   :  { %v979_v4 = vpop.permute.xlu1 %978  ;;  %v1003_v51 = vpop.permute.xlu0 %1002 }
 0x8da   :  { %v1013_v52 = vsel %vm186_vm1, %v1009_v35, %v1003_v51  ;;  %v2514_v23 = vpop.permute.xlu2 %946 }
 0x8db   :  { %v1049_v26 = vmul.f32 %v1495_v0, %v1013_v52  ;;  %v1508_v52 = vld [vmem:[%s2879_s1 + $0xa0] sm:$0xff] }
 0x8dd   :  { %1125 = vmatpush.msrb.mxu3 %v1049_v26 }
 0x8df   :  { %1126 = vmatpush.msrb.mxu3 %v1045_v62  ;;  %v1030_v62 = vmul.f32 %v2342_v5, %v2415_v7  ;;  %v1510_v5 = vld [vmem:[%s2879_s1 + $0x58] sm:$0xff] }
 0x8e1   :  { %v2516_v36 = vpop.permute.xlu1 %956  ;;  %v985_v49 = vpop.permute.xlu0 %984 }
 0x8e2   :  { %v986_v24 = vsel %vm160_vm3, %v2479_v19, %v985_v49  ;;  %v989_v25 = vsel %vm160_vm3, %v985_v49, %v979_v4  ;;  %v2527_v6 = vpop.permute.xlu2 %932  ;;  %v963_v27 = vsel %vm134_vm5, %v2516_v36, %v2501_v32 }
 0x8e3   :  { %v1040_v34 = vmul.f32 %v1497_v16, %v986_v24  ;;  %v1041_v43 = vmul.f32 %v2310_v54, %v989_v25  ;;  %v1028_v53 = vmul.f32 %v1502_v31, %v963_v27  ;;  %v1031_v25 = vmul.f32 %v2349_v13, %v2429_v58  ;;  %v1513_v27 = vld [vmem:[%s2879_s1 + $0x68] sm:$0xff]  ;;  %v1517_v31 = vld [vmem:[%s2879_s1 + $0x40] sm:$0xff] }
 0x8e5   :  { %1107 = vmatpush.msrb.mxu2 %v1040_v34  ;;  %1127 = vmatpush.msrb.mxu3 %v1041_v43  ;;  %v1564_v43 = vmov 6  }
 0x8e6   :  { %1459 = vset.pattern.permute.xlu2 %v1564_v43  ;;  %1460 = vset.pattern.permute.xlu0 %v1564_v43  ;;  %v1228_v43 = vld [vmem:[%s2882_s4 + $0x28] sm:$0xff] }
 0x8e9   :  { %v2529_v8 = vpop.permute.xlu1 %944  ;;  %v973_v10 = vpop.permute.xlu0 %972 }
 0x8ea   :  { %v974_v15 = vsel %vm147_vm4, %v2481_v40, %v973_v10  ;;  %v977_v48 = vsel %vm147_vm4, %v973_v10, %v2488_v50  ;;  %v951_v56 = vsel %vm121_vm6, %v2529_v8, %v2514_v23  ;;  %v969_v14 = vpop.permute.xlu2 %968 }
 0x8eb   :  { %v1036_v54 = vmul.f32 %v1498_v2, %v974_v15  ;;  %v1037_v28 = vmul.f32 %v1499_v47, %v977_v48  ;;  %v1024_v37 = vmul.f32 %v1503_v63, %v951_v56  ;;  %v976_v21 = vsel %vm147_vm4, %v2488_v50, %v969_v14  ;;  %v1507_v50 = vld [vmem:[%s2879_s1 + $0xc8] sm:$0xff]  ;;  %v1511_v2 = vld [vmem:[%s2881_s3] sm:$0xff] }
 0x8ec   :  { %v1034_v0 = vmul.f32 %v1508_v52, %v976_v21  ;;  %1052 = vperm.xlu2 %1459, %v1511_v2   ;;  %v1521_v21 = vld [vmem:[%s2879_s1 + $0x28] sm:$0xff]  ;;  %v1226_v2 = vld [vmem:[%s2882_s4 + $0x18] sm:$0xff] }
 0x8ed   :  { %1108 = vmatpush.msrb.mxu2 %v1036_v54  ;;  %1128 = vmatpush.msrb.mxu3 %v1037_v28  ;;  %v1514_v28 = vld [vmem:[%s2879_s1 + $0x30] sm:$0xff]  ;;  %v1252_v52 = vld [vmem:[%s2882_s4 + $0xe8] sm:$0xff] }
 0x8ef   :  { %1109 = vmatpush.msrb.mxu2 %v1032_v38  ;;  %1129 = vmatpush.msrb.mxu3 %v1033_v30  ;;  %v1515_v38 = vld [vmem:[%s2879_s1 + $0x38] sm:$0xff] }
 0x8f1   :  { %v981_v46 = vpop.permute.xlu1 %980  ;;  %1110 = vmatpush.msrb.mxu2 %v1028_v53  ;;  %v1005_v3 = vpop.permute.xlu0 %1004 }
 0x8f2   :  { %v1011_v20 = vsel %vm186_vm1, %v1005_v3, %v2477_v18  ;;  %v1012_v41 = vsel %vm186_vm1, %v1003_v51, %v1005_v3  ;;  %v988_v44 = vsel %vm160_vm3, %v979_v4, %v981_v46  ;;  %v2589_v17 = vpop.permute.xlu2 %936  ;;  %v1506_v4 = vld [vmem:[%s2879_s1 + $0xc0] sm:$0xff] }
 0x8f3   :  { %v1046_v42 = vmul.f32 %v2285_v33, %v1012_v41  ;;  %v1047_v35 = vmul.f32 %v2291_v12, %v1011_v20  ;;  %1111 = vmatpush.msrb.mxu2 %v1024_v37  ;;  %v987_v33 = vsel %vm160_vm3, %v981_v46, %v2479_v19  ;;  %v1504_v12 = vld [vmem:[%s2879_s1 + $0xe0] sm:$0xff]  ;;  %v975_v19 = vsel %vm147_vm4, %v969_v14, %v2481_v40  ;;  %v1518_v46 = vld [vmem:[%s2879_s1 + $0x10] sm:$0xff]  ;;  %v69_v14 = vld [vmem:[%s2880_s2 + $0x18] sm:$0xff] }
 0x8f4   :  { %v1038_v51 = vmul.f32 %v1506_v4, %v988_v44  ;;  %v1039_v29 = vmul.f32 %v1507_v50, %v987_v33  ;;  %v1035_v40 = vmul.f32 %v2335_v1, %v975_v19  ;;  %v1509_v1 = vld [vmem:[%s2879_s1 + $0x78] sm:$0xff]  ;;  %v1253_v50 = vld [vmem:[%s2882_s4 + $0xf0] sm:$0xff] }
 0x8f5   :  { %1065 = vmatpush.msrb.mxu0 %v1046_v42  ;;  %1085 = vmatpush.msrb.mxu1 %v1047_v35  ;;  %v1519_v42 = vld [vmem:[%s2879_s1 + $0x18] sm:$0xff] }
 0x8f6   :  { %v1254_v4 = vld [vmem:[%s2882_s4 + $0xf8] sm:$0xff] }
 0x8f9   :  { %v949_v9 = vpop.permute.xlu1 %948  ;;  %v993_v55 = vpop.permute.xlu0 %992 }
 0x8fa   :  { %v999_v22 = vsel %vm173_vm2, %v993_v55, %v2483_v39  ;;  %v1000_v18 = vsel %vm173_vm2, %v2493_v59, %v993_v55  ;;  %v1505_v39 = vld [vmem:[%s2879_s1 + $0xe8] sm:$0xff]  ;;  %v950_v49 = vsel %vm121_vm6, %v2514_v23, %v949_v9  ;;  %v943_v23 = vpop.permute.xlu2 %942 }
 0x8fb   :  { %v1042_v60 = vmul.f32 %v1504_v12, %v1000_v18  ;;  %v1043_v59 = vmul.f32 %v1505_v39, %v999_v22  ;;  %v1025_v7 = vmul.f32 %v1510_v5, %v950_v49  ;;  %v953_v13 = vsel %vm121_vm6, %v949_v9, %v943_v23  ;;  %v1520_v12 = vld [vmem:[%s2879_s1 + $0x20] sm:$0xff]  ;;  %v1249_v49 = vld [vmem:[%s2882_s4 + $0xd0] sm:$0xff]  ;;  %v1230_v5 = vld [vmem:[%s2882_s4 + $0x38] sm:$0xff] }
 0x8fc   :  { %v1022_v53 = vmul.f32 %v1517_v31, %v953_v13  ;;  %v1245_v13 = vld [vmem:[%s2882_s4 + $0xb0] sm:$0xff] }
 0x8fd   :  { %1066 = vmatpush.msrb.mxu0 %v1042_v60  ;;  %1086 = vmatpush.msrb.mxu1 %v1043_v59  ;;  %v1522_v59 = vld [vmem:[%s2879_s1 + $0x8] sm:$0xff] }
 0x8ff   :  { %1067 = vmatpush.msrb.mxu0 %v1038_v51  ;;  %1087 = vmatpush.msrb.mxu1 %v1039_v29  ;;  %v1237_v51 = vld [vmem:[%s2882_s4 + $0x70] sm:$0xff]  ;;  %v1236_v29 = vld [vmem:[%s2882_s4 + $0x68] sm:$0xff] }
 0x901   :  { %v923_v26 = vpop.permute.xlu1 %922  ;;  %1068 = vmatpush.msrb.mxu0 %v1034_v0  ;;  %v961_v61 = vpop.permute.xlu0 %960  ;;  %1088 = vmatpush.msrb.mxu1 %v1035_v40  ;;  %v1235_v0 = vld [vmem:[%s2882_s4 + $0x60] sm:$0xff] }
 0x902   :  { %v962_v24 = vsel %vm134_vm5, %v2501_v32, %v961_v61  ;;  %v952_v32 = vsel %vm121_vm6, %v943_v23, %v2529_v8  ;;  %v1251_v40 = vld [vmem:[%s2882_s4 + $0xe0] sm:$0xff] }
 0x903   :  { %v1029_v16 = vmul.f32 %v1509_v1, %v962_v24  ;;  %1069 = vmatpush.msrb.mxu0 %v1030_v62  ;;  %1089 = vmatpush.msrb.mxu1 %v1031_v25  ;;  %v1023_v30 = vmul.f32 %v1516_v57, %v952_v32  ;;  %v1233_v62 = vld [vmem:[%s2882_s4 + $0x50] sm:$0xff]  ;;  %v1232_v24 = vld [vmem:[%s2882_s4 + $0x48] sm:$0xff]  ;;  %v1231_v1 = vld [vmem:[%s2882_s4 + $0x40] sm:$0xff] }
 0x904   :  { %v1248_v25 = vld [vmem:[%s2882_s4 + $0xc8] sm:$0xff]  ;;  %v1229_v32 = vld [vmem:[%s2882_s4 + $0x30] sm:$0xff]  ;;  %v1239_v57 = vld [vmem:[%s2882_s4 + $0x80] sm:$0xff] }
 0x905   :  { %1130 = vmatpush.msrb.mxu3 %v1029_v16  ;;  %v1247_v16 = vld [vmem:[%s2882_s4 + $0xc0] sm:$0xff] }
 0x907   :  { %1131 = vmatpush.msrb.mxu3 %v1025_v7  ;;  %v1246_v7 = vld [vmem:[%s2882_s4 + $0xb8] sm:$0xff] }
 0x909   :  { %v955_v58 = vpop.permute.xlu1 %954  ;;  %v935_v34 = vpop.permute.xlu0 %934 }
 0x90a   :  { %v964_v10 = vsel %vm134_vm5, %v955_v58, %v2516_v36  ;;  %v965_v15 = vsel %vm134_vm5, %v961_v61, %v955_v58  ;;  %v938_v48 = vsel %vm108_vm7, %v935_v34, %v2589_v17  ;;  %v939_v8 = vsel %vm108_vm7, %v2527_v6, %v935_v34  ;;  %v1512_v36 = vld [vmem:[%s2879_s1 + $0x60] sm:$0xff]  ;;  %v1250_v61 = vld [vmem:[%s2882_s4 + $0xd8] sm:$0xff] }
 0x90b   :  { %v1026_v54 = vmul.f32 %v1512_v36, %v965_v15  ;;  %v1027_v47 = vmul.f32 %v1513_v27, %v964_v10  ;;  %v1020_v45 = vmul.f32 %v1514_v28, %v939_v8  ;;  %v1021_v56 = vmul.f32 %v1515_v38, %v938_v48  ;;  %v1244_v10 = vld [vmem:[%s2882_s4 + $0xa8] sm:$0xff]  ;;  %v1227_v48 = vld [vmem:[%s2882_s4 + $0x20] sm:$0xff]  ;;  %v1242_v36 = vld [vmem:[%s2882_s4 + $0x98] sm:$0xff] }
 0x90c   :  { %v1243_v8 = vld [vmem:[%s2882_s4 + $0xa0] sm:$0xff]  ;;  %v1241_v27 = vld [vmem:[%s2882_s4 + $0x90] sm:$0xff]  ;;  %v1240_v28 = vld [vmem:[%s2882_s4 + $0x88] sm:$0xff] }
 0x90d   :  { %1070 = vmatpush.msrb.mxu0 %v1026_v54  ;;  %1090 = vmatpush.msrb.mxu1 %v1027_v47  ;;  %v1225_v54 = vld [vmem:[%s2882_s4 + $0x10] sm:$0xff]  ;;  %v1224_v47 = vld [vmem:[%s2882_s4 + $0x8] sm:$0xff] }
 0x90e   :  { %1112 = vmatpush.msrb.mxu2 %v1020_v45  ;;  %1132 = vmatpush.msrb.mxu3 %v1021_v56  ;;  %v1223_v56 = vld [vmem:[%s2882_s4] sm:$0xff] }
 0x90f   :  { %1071 = vmatpush.msrb.mxu0 %v1022_v53  ;;  %1091 = vmatpush.msrb.mxu1 %v1023_v30 }
 0x911   :  { %v921_v63 = vpop.permute.xlu0 %920  ;;  %v919_v9 = vpop.permute.xlu1 %918 }
 0x912   :  { %v927_v37 = vsel %vm95_vm8, %v921_v63, %v923_v26  ;;  %v928_v44 = vsel %vm95_vm8, %v919_v9, %v921_v63 }
 0x913   :  { %v1016_v3 = vmul.f32 %v1518_v46, %v927_v37  ;;  %v1015_v19 = vmul.f32 %v1522_v59, %v928_v44 }
 0x915   :  { %1113 = vmatpush.msrb.mxu2 %v1016_v3 }
 0x916   :  { %1428 = vmatmul.msk.f32.vlgmr.msrb.gmra.mxu2 %vm227_vm9, %v69_v14 }
 0x919   :  { %v925_v20 = vpop.permute.xlu0 %924 }
 0x91a   :  { %v926_v41 = vsel %vm95_vm8, %v923_v26, %v925_v20  ;;  %v929_v22 = vsel %vm95_vm8, %v925_v20, %v919_v9  ;;  %v1234_v26 = vld [vmem:[%s2882_s4 + $0x58] sm:$0xff]  ;;  %v1303_v20 = vld [vmem:[%s2883_s5 + $0x30] sm:$0xff]  ;;  %v1301_v9 = vld [vmem:[%s2883_s5 + $0x20] sm:$0xff] }
 0x91b   :  { %v1017_v35 = vmul.f32 %v1519_v42, %v926_v41 }
 0x91d   :  { %1133 = vmatpush.msrb.mxu3 %v1017_v35  ;;  %v1302_v35 = vld [vmem:[%s2883_s5 + $0x28] sm:$0xff] }
 0x91e   :  { %1429 = vmatmul.msk.f32.vlgmr.msrb.gmra.mxu3 %vm227_vm9, %v69_v14 }
 0x921   :  { %v931_v55 = vpop.permute.xlu0 %930 }
 0x922   :  { %v940_v18 = vsel %vm108_vm7, %v931_v55, %v2527_v6  ;;  %v941_v33 = vsel %vm108_vm7, %v2589_v17, %v931_v55  ;;  %v1014_v6 = vmul.f32 %v1523_v11, %v929_v22  ;;  %v1238_v17 = vld [vmem:[%s2882_s4 + $0x78] sm:$0xff] }
 0x923   :  { %v1018_v60 = vmul.f32 %v1520_v12, %v941_v33  ;;  %v1019_v39 = vmul.f32 %v1521_v21, %v940_v18 }
 0x925   :  { %1072 = vmatpush.msrb.mxu0 %v1018_v60  ;;  %1092 = vmatpush.msrb.mxu1 %v1019_v39 }
 0x927   :  { %1073 = vmatpush.msrb.mxu0 %v1014_v6  ;;  %1093 = vmatpush.msrb.mxu1 %v1015_v19 }
 0x928   :  { %1426 = vmatmul.msk.f32.vlgmr.msrb.gmra.mxu0 %vm227_vm9, %v69_v14  ;;  %1427 = vmatmul.msk.f32.vlgmr.msrb.gmra.mxu1 %vm227_vm9, %v69_v14  ;;  %v1304_v14 = vld [vmem:[%s2883_s5 + $0x38] sm:$0xff] }
 0x929   :  { %1256 = vmatpush.msra.mxu0 %v1238_v17  ;;  %1276 = vmatpush.msra.mxu1 %v1254_v4 }
 0x92a   :  { %1318 = vmatpush.msra.mxu2 %v1304_v14 }
 0x92b   :  { %1257 = vmatpush.msra.mxu0 %v1237_v51  ;;  %1277 = vmatpush.msra.mxu1 %v1253_v50 }
 0x92c   :  { %1319 = vmatpush.msra.mxu2 %v1303_v20 }
 0x92d   :  { %1258 = vmatpush.msra.mxu0 %v1236_v29  ;;  %1278 = vmatpush.msra.mxu1 %v1252_v52 }
 0x92e   :  { %1320 = vmatpush.msra.mxu2 %v1302_v35 }
 0x92f   :  { %1259 = vmatpush.msra.mxu0 %v1235_v0  ;;  %1279 = vmatpush.msra.mxu1 %v1251_v40 }
 0x930   :  { %1321 = vmatpush.msra.mxu2 %v1301_v9 }
 0x931   :  { %1260 = vmatpush.msra.mxu0 %v1234_v26  ;;  %1280 = vmatpush.msra.mxu1 %v1250_v61 }
 0x933   :  { %1261 = vmatpush.msra.mxu0 %v1233_v62  ;;  %1281 = vmatpush.msra.mxu1 %v1249_v49  ;;  %v1364_v62 = vld [vmem:[%s2884_s6] sm:$0xff] }
 0x935   :  { %1262 = vmatpush.msra.mxu0 %v1232_v24  ;;  %1282 = vmatpush.msra.mxu1 %v1248_v25 }
 0x937   :  { %1263 = vmatpush.msra.mxu0 %v1231_v1  ;;  %1283 = vmatpush.msra.mxu1 %v1247_v16 }
 0x939   :  { %1264 = vmatpush.msra.mxu0 %v1230_v5  ;;  %1284 = vmatpush.msra.mxu1 %v1246_v7 }
 0x93b   :  { %1265 = vmatpush.msra.mxu0 %v1229_v32  ;;  %1285 = vmatpush.msra.mxu1 %v1245_v13 }
 0x93d   :  { %1266 = vmatpush.msra.mxu0 %v1228_v43  ;;  %1286 = vmatpush.msra.mxu1 %v1244_v10 }
 0x93f   :  { %1267 = vmatpush.msra.mxu0 %v1227_v48  ;;  %1287 = vmatpush.msra.mxu1 %v1243_v8 }
 0x941   :  { %1268 = vmatpush.msra.mxu0 %v1226_v2  ;;  %1288 = vmatpush.msra.mxu1 %v1242_v36 }
 0x943   :  { %1269 = vmatpush.msra.mxu0 %v1225_v54  ;;  %1289 = vmatpush.msra.mxu1 %v1241_v27 }
 0x945   :  { %1270 = vmatpush.msra.mxu0 %v1224_v47  ;;  %1290 = vmatpush.msra.mxu1 %v1240_v28 }
 0x946   :  { %v1053_v23 = vpop.permute.xlu2 %1052 }
 0x947   :  { %1271 = vmatpush.msra.mxu0 %v1223_v56  ;;  %1291 = vmatpush.msra.mxu1 %v1239_v57 }
 0x999   :  { %v1115_v58 = vpop.f32.mrf.mxu2 }
 0x99a   :  { %v1116_v34 = vadd.f32 %v1115_v58, %v1053_v23 }
 0x99c   :  { %v1432_v15 = vmul.f32 -1.442695, %v1116_v34 }
 0x99e   :  { %1467 = vpow2.f32 %v1432_v15 }
 0x9a1   :  { %v1135_v45 = vpop.f32.mrf.mxu3 }
 0x9a2   :  { %v1136_v38 = vadd.f32 %v1135_v45, %v1053_v23 }
 0x9a4   :  { %v1468_v30 = vpop.eup %1467  ;;  %v1433_v31 = vmul.f32 -1.442695, %v1136_v38 }
 0x9a5   :  { %v1152_v53 = vadd.f32 1.0, %v1468_v30  ;;  %v1075_v63 = vpop.f32.mrf.mxu0  ;;  %v1095_v37 = vpop.f32.mrf.mxu1 }
 0x9a6   :  { %1469 = vpow2.f32 %v1433_v31  ;;  %v1076_v46 = vadd.f32 %v1075_v63, %v1053_v23  ;;  %v1096_v3 = vadd.f32 %v1095_v37, %v1053_v23  ;;  %v1299_v63 = vld [vmem:[%s2883_s5 + $0x10] sm:$0xff]  ;;  %v1298_v37 = vld [vmem:[%s2883_s5 + $0x8] sm:$0xff] }
 0x9a7   :  { %1471 = vrcp.f32 %v1152_v53  ;;  %vm1189_vm1 = vweird.f32 %v1152_v53  ;;  %v1193_v6 = vand.u32 2147483647, %v1152_v53  ;;  %v1195_v17 = vand.u32 2147483648, %v1152_v53 }
 0x9a8   :  { %v1430_v41 = vmul.f32 -1.442695, %v1076_v46  ;;  %v1431_v42 = vmul.f32 -1.442695, %v1096_v3  ;;  %v1297_v46 = vld [vmem:[%s2883_s5] sm:$0xff] }
 0x9a9   :  { %vm2811_vm5 = vcmp.eq.f32.partialorder %v1193_v6, 8.507059e+37  ;;  %v1196_v24 = vor.u32 1.1754944e-38, %v1195_v17  ;;  %v2840_v3 = vld [vmem:[%s2885_s7] sm:$0x1f] }
 0x9aa   :  { %1473 = vpow2.f32 %v1430_v41  ;;  %v1255_v14 = vperm.slane %v2840_v3, 0 }
 0x9ab   :  { %1475 = vpow2.f32 %v1431_v42 }
 0x9ac   :  { %v1470_v55 = vpop.eup %1469 }
 0x9ad   :  { %v1472_v44 = vpop.eup %1471  ;;  %v1153_v22 = vadd.f32 1.0, %v1470_v55  ;;  %v1305_v55 = vperm.slane %v2840_v3, 1 }
 0x9ae   :  { %v1185_v18 = vmul.f32 %v1472_v44, %v1152_v53  ;;  %vm1190_vm2 = vweird.f32 %v1472_v44  ;;  %v1300_v53 = vld [vmem:[%s2883_s5 + $0x18] sm:$0xff] }
 0x9af   :  { %1477 = vrcp.f32 %v1153_v22  ;;  %v1208_v50 = vand.u32 2147483647, %v1153_v22  ;;  %v1210_v52 = vand.u32 2147483648, %v1153_v22  ;;  %vm2807_vm4 = vmor %vm1189_vm1, %vm1190_vm2  ;;  %vm1204_vm6 = vweird.f32 %v1153_v22  ;;  %1322 = vmatpush.msra.mxu2 %v1300_v53 }
 0x9b0   :  { %v1474_v33 = vpop.eup %1473  ;;  %v1186_v12 = vsub.f32 1.0, %v1185_v18  ;;  %vm1306_vm2 = vcmask 523264  }
 0x9b1   :  { %v1476_v60 = vpop.eup %1475  ;;  %v1150_v21 = vadd.f32 1.0, %v1474_v33  ;;  %vm2817_vm7 = vcmp.eq.f32.partialorder %v1208_v50, 8.507059e+37  ;;  %v1211_v13 = vor.u32 1.1754944e-38, %v1210_v52  ;;  %1323 = vmatpush.msra.mxu2 %v1299_v63  ;;  %v1565_v33 = vmov 64.0   ;;  %v1371_v50 = vld [vmem:[%s2884_s6 + $0x38] sm:$0xff]  ;;  %v1369_v52 = vld [vmem:[%s2884_s6 + $0x28] sm:$0xff] }
 0x9b2   :  { %v1151_v39 = vadd.f32 1.0, %v1476_v60  ;;  %v1187_v59 = vmul.f32 %v1472_v44, %v1186_v12  ;;  %1384 = vmatpush.msra.mxu3 %v1371_v50 }
 0x9b3   :  { %1479 = vrcp.f32 %v1150_v21  ;;  %v1163_v23 = vand.u32 2147483647, %v1150_v21  ;;  %v1165_v32 = vand.u32 2147483648, %v1150_v21  ;;  %vm1159_vm13 = vweird.f32 %v1150_v21  ;;  %1324 = vmatpush.msra.mxu2 %v1298_v37 }
 0x9b4   :  { %1481 = vrcp.f32 %v1151_v39  ;;  %v1188_v51 = vadd.f32 %v1472_v44, %v1187_v59  ;;  %v1180_v34 = vand.u32 2147483648, %v1151_v39  ;;  %v1178_v48 = vand.u32 2147483647, %v1151_v39 }
 0x9b5   :  { %v1478_v19 = vpop.eup %1477  ;;  %v1166_v36 = vor.u32 1.1754944e-38, %v1165_v32  ;;  %vm1174_vm0 = vweird.f32 %v1151_v39  ;;  %vm1164_vm10 = vcmp.eq.f32.partialorder %v1163_v23, 8.507059e+37  ;;  %1325 = vmatpush.msra.mxu2 %v1297_v46  ;;  %1483 = vrcp.f32 %v1565_v33 }
 0x9b6   :  { %v1200_v11 = vmul.f32 %v1478_v19, %v1153_v22  ;;  %vm1205_vm3 = vweird.f32 %v1478_v19  ;;  %v1192_v1 = vsel %vm2807_vm4, %v1472_v44, %v1188_v51  ;;  %v1181_v28 = vor.u32 1.1754944e-38, %v1180_v34 }
 0x9b7   :  { %vm1206_vm8 = vmor %vm1204_vm6, %vm1205_vm3  ;;  %v1197_v10 = vsel %vm2811_vm5, %v1196_v24, %v1192_v1  ;;  %vm1179_vm1 = vcmp.eq.f32.partialorder %v1178_v48, 8.507059e+37 }
 0x9b8   :  { %v1201_v4 = vsub.f32 1.0, %v1200_v11  ;;  %v1216_v47 = vrot.slane %v1197_v10, 4 }
 0x9b9   :  { %v1480_v29 = vpop.eup %1479 }
 0x9ba   :  { %v1482_v0 = vpop.eup %1481  ;;  %v1155_v40 = vmul.f32 %v1480_v29, %v1150_v21  ;;  %v1202_v26 = vmul.f32 %v1478_v19, %v1201_v4  ;;  %vm1160_vm9 = vweird.f32 %v1480_v29 }
 0x9bb   :  { %v1170_v61 = vmul.f32 %v1482_v0, %v1151_v39  ;;  %vm1175_vm12 = vweird.f32 %v1482_v0  ;;  %vm1161_vm14 = vmor %vm1159_vm13, %vm1160_vm9  ;;  %v1484_v12 = vpop.eup %1483 }
 0x9bc   :  { %v1156_v25 = vsub.f32 1.0, %v1155_v40  ;;  %v1203_v16 = vadd.f32 %v1478_v19, %v1202_v26  ;;  %vm1176_vm11 = vmor %vm1174_vm0, %vm1175_vm12  ;;  %v1334_v60 = vmul.f32 64.0, %v1484_v12  ;;  %vm1338_vm3 = vweird.f32 %v1484_v12  ;;  %v1367_v40 = vld [vmem:[%s2884_s6 + $0x18] sm:$0xff]  ;;  %v1366_v26 = vld [vmem:[%s2884_s6 + $0x10] sm:$0xff] }
 0x9bd   :  { %v1171_v7 = vsub.f32 1.0, %v1170_v61  ;;  %v1365_v61 = vld [vmem:[%s2884_s6 + $0x8] sm:$0xff] }
 0x9be   :  { %v1157_v58 = vmul.f32 %v1480_v29, %v1156_v25  ;;  %v1207_v43 = vsel %vm1206_vm8, %v1478_v19, %v1203_v16  ;;  %v1335_v21 = vsub.f32 1.0, %v1334_v60 }
 0x9bf   :  { %v1172_v15 = vmul.f32 %v1482_v0, %v1171_v7  ;;  %v1212_v2 = vsel %vm2817_vm7, %v1211_v13, %v1207_v43  ;;  %v1359_v13 = vperm.slane %v2840_v3, 2  ;;  %v1361_v43 = vperm.slane %v2840_v3, 3 }
 0x9c0   :  { %v1158_v8 = vadd.f32 %v1480_v29, %v1157_v58  ;;  %v1217_v56 = vrot.slane %v1212_v2, 4  ;;  %v1336_v39 = vmul.f32 %v1484_v12, %v1335_v21  ;;  %vm1396_vm7 = vcmask 64512  }
 0x9c1   :  { %v1173_v54 = vadd.f32 %v1482_v0, %v1172_v15 }
 0x9c2   :  { %v1162_v27 = vsel %vm1161_vm14, %v1480_v29, %v1158_v8  ;;  %v1337_v59 = vadd.f32 %v1484_v12, %v1336_v39  ;;  %v1370_v29 = vld [vmem:[%s2884_s6 + $0x30] sm:$0xff]  ;;  %v1372_v8 = vperm.slane %v2840_v3, 4 }
 0x9c3   :  { %v1167_v45 = vsel %vm1164_vm10, %v1166_v36, %v1162_v27  ;;  %v1177_v38 = vsel %vm1176_vm11, %v1482_v0, %v1173_v54  ;;  %1385 = vmatpush.msra.mxu3 %v1370_v29  ;;  %v1368_v0 = vld [vmem:[%s2884_s6 + $0x20] sm:$0xff]  ;;  %s1566_s6 = smov [#allocation2]  }
 0x9c4   :  { %v1221_v57 = vsel %vm1220_vm15, %v1167_v45, %v1216_v47  ;;  %v1182_v30 = vsel %vm1179_vm1, %v1181_v28, %v1177_v38  ;;  %v1339_v19 = vsel %vm1338_vm3, %v1484_v12, %v1337_v59  ;;  %s1403_s15 = sshll.u32 %s1566_s6, 4  ;;  %s1404_s15 = int_to_ptr.vmem [resolvable:$true] %s1403_s15 }
 0x9c5   :  { %1272 = vmatmul.f32.vlgmr.msra.gmra.mxu0 %v1221_v57  ;;  %v1222_v31 = vsel %vm1220_vm15, %v1182_v30, %v1217_v56  ;;  %1386 = vmatpush.msra.mxu3 %v1369_v52 }
 0x9c6   :  { %1292 = vmatmul.f32.vlgmr.msra.gmra.mxu1 %v1222_v31 }
 0x9c7   :  { %1387 = vmatpush.msra.mxu3 %v1368_v0 }
 0x9c9   :  { %1388 = vmatpush.msra.mxu3 %v1367_v40 }
 0x9cb   :  { %1389 = vmatpush.msra.mxu3 %v1366_v26 }
 0x9cd   :  { %1390 = vmatpush.msra.mxu3 %v1365_v61 }
 0x9cf   :  { %1391 = vmatpush.msra.mxu3 %v1364_v62 }
 0xa42   :  { %v1273_v20 = vpop.f32.mrf.mxu0 }
 0xa43   :  { %v1274_v41 = vadd.f32 %v1273_v20, %v1255_v14  ;;  %v1293_v42 = vpop.f32.mrf.mxu1 }
 0xa45   :  { %v1294_v35 = vadd.f32 %v1293_v42, %v1274_v41 }
 0xa47   :  { %v1296_v9 = vmax.f32 %v1294_v35, 0.0 }
 0xa49   :  { %1434 = vmatmul.msk.f32.vlgmr.msra.gmra.mxu2 %vm1306_vm2, %v1296_v9 }
 0xacc   :  { %v1327_v44 = vpop.f32.mrf.mxu2 }
 0xacd   :  { %v1328_v22 = vadd.f32 %v1327_v44, %v1305_v55 }
 0xacf   :  { %v1330_v18 = vsel %vm1306_vm2, %v1328_v22, 0.0 }
 0xad0   :  { %1331 = vadd.xlane.f32.xlu0 %v1330_v18 }
 0xb43   :  { %v1332_v11 = vpop.xlane.xlu0 %1331 }
 0xb44   :  { %v1340_v6 = vmul.f32 %v1339_v19, %v1332_v11 }
 0xb46   :  { %v1341_v17 = vsub.f32 %v1328_v22, %v1340_v6 }
 0xb48   :  { %v1342_v4 = vmul.f32 %v1341_v17, %v1341_v17 }
 0xb4a   :  { %v1343_v51 = vsel %vm1306_vm2, %v1342_v4, 0.0 }
 0xb4b   :  { %1344 = vadd.xlane.f32.xlu1 %v1343_v51 }
 0xbbe   :  { %v1345_v49 = vpop.xlane.xlu1 %1344 }
 0xbbf   :  { %v1346_v24 = vmul.f32 %v1345_v49, %v1339_v19 }
 0xbc1   :  { %v1347_v25 = vadd.f32 1e-05, %v1346_v24 }
 0xbc3   :  { %1485 = vrsqrt.f32 %v1347_v25  ;;  %vm1354_vm5 = vweird.f32 %v1347_v25 }
 0xbc9   :  { %v1486_v1 = vpop.eup %1485 }
 0xbca   :  { %v1349_v16 = vmul.f32 %v1486_v1, %v1347_v25  ;;  %vm1355_vm4 = vweird.f32 %v1486_v1 }
 0xbcb   :  { %vm1356_vm6 = vmor %vm1354_vm5, %vm1355_vm4 }
 0xbcc   :  { %v1350_v5 = vmul.f32 %v1486_v1, %v1349_v16 }
 0xbce   :  { %v1351_v7 = vmul.f32 0.5, %v1350_v5 }
 0xbd0   :  { %v1352_v23 = vsub.f32 1.5, %v1351_v7 }
 0xbd2   :  { %v1353_v32 = vmul.f32 %v1486_v1, %v1352_v23 }
 0xbd4   :  { %v1357_v58 = vsel %vm1356_vm6, %v1486_v1, %v1353_v32 }
 0xbd5   :  { %v1358_v34 = vmul.f32 %v1357_v58, %v1341_v17 }
 0xbd7   :  { %v1360_v10 = vmul.f32 %v1359_v13, %v1358_v34 }
 0xbd9   :  { %v1362_v15 = vadd.f32 %v1361_v43, %v1360_v10 }
 0xbdb   :  { %v1363_v48 = vmax.f32 %v1362_v15, 0.0 }
 0xbdd   :  { %1435 = vmatmul.msk.f32.vlgmr.msra.gmra.mxu3 %vm1306_vm2, %v1363_v48 }
 0xc60   :  { %v1393_v2 = vpop.f32.mrf.mxu3 }
 0xc61   :  { %v1394_v36 = vadd.f32 %v1393_v2, %v1372_v8 }
 0xc63   :  { %1397 = vst.msk [vmem:[#allocation2] sm:$0xff] %vm1396_vm7, %v1394_v36 }
 0xc64   :  { %1408 = dma.vmem_to_hbm [thread:$0]  %s1404_s15, 128, %s1406_s19, [#allocation3]  }
 0xc65   :  { %1548 = dma.done.wait [#allocation3], 128  }
 0xc66   :  { %1549 = vsyncadd [#allocation3], 4294967168 }
 0xc67   :  { %1413 = vsyncpa [#allocation3], 1 }

</bundles_post_ra>
